<compile_context>
chip_gen: v7x
topology: tpu7x:2x2x1
jax: 0.10.0
libtpu: 0.0.40
codegen_flags: <defaults>
</compile_context>

<pallas_src>
import jax
import jax.numpy as jnp
from jax.experimental import pallas as pl
from jax.experimental.pallas import tpu as pltpu


def _spatio_conv_kernel(x_ref, lkt_ref, th_ref, b_ref, o_ref):
    # x_ref  : (Nb, C, T, N)  VMEM block of the input
    # lkt_ref: (ks, N, N)     VMEM, lkt[k, m, n] = Lk[k, n, m]
    # th_ref : (ks*C*C,)      SMEM, th[(k*C + o)*C + i] = theta[i, o, k]
    # b_ref  : (C,)           SMEM, bias per output channel
    # o_ref  : (Nb, C, T, N)  VMEM output block
    nb, c, t, n = x_ref.shape
    ks = lkt_ref.shape[0]

    x = x_ref[...]                                 # (Nb, C, T, N)
    # rows = (b, i, t), lanes = nodes m -> one MXU matmul per Chebyshev order.
    x2 = x.reshape(nb * c * t, n)

    # residual + bias (fused); one accumulator per output channel o.
    accs = [x[:, o, :, :] + b_ref[o] for o in range(c)]   # each (Nb, T, N)

    for k in range(ks):
        # node mixing on the MXU: v[(b,i,t), n] = sum_m x[b,i,t,m] * Lk[k,n,m]
        v = jnp.dot(x2, lkt_ref[k], preferred_element_type=jnp.float32)
        v4 = v.reshape(nb, c, t, n)
        # channel mixing (C is small): unrolled scalar-FMA on the VPU.
        for i in range(c):
            vi = v4[:, i, :, :]                    # (Nb, T, N)
            for o in range(c):
                accs[o] = accs[o] + th_ref[(k * c + o) * c + i] * vi

    for o in range(c):
        o_ref[:, o, :, :] = jnp.maximum(accs[o], 0.0).astype(o_ref.dtype)


def _pick_batch_block(batch, per_batch_bytes, target_bytes=1 << 20):
    """Largest divisor of `batch` whose tile fits `target_bytes`, keeping >=2 grid steps."""
    divisors = [d for d in range(1, batch + 1) if batch % d == 0]
    best = 1
    for d in divisors:
        if d * per_batch_bytes <= target_bytes:
            best = d
    # keep at least two grid steps so v7x megacore can split the parallel axis
    while best > 1 and batch // best < 2:
        best = [d for d in divisors if d < best][-1]
    return best


def spatio_conv_layer(x, Lk, theta, b):
    """x: (B, C, T, N), Lk: (ks, N, N), theta: (C, C, ks), b: (1, C, 1, 1) -> (B, C, T, N)."""
    B, C, T, N = x.shape
    ks = Lk.shape[0]
    assert Lk.shape == (ks, N, N)
    assert theta.shape == (C, C, ks)
    assert b.shape == (1, C, 1, 1)

    # Pre-arrange the (small) weights in the wrapper so the kernel only does
    # clean matmuls / scalar FMAs.
    lkt = jnp.transpose(Lk, (0, 2, 1))                          # lkt[k, m, n] = Lk[k, n, m]
    th_flat = jnp.transpose(theta, (2, 1, 0)).reshape(ks * C * C)  # [(k*C+o)*C + i] = theta[i,o,k]
    b_flat = b.reshape(C)

    per_batch_bytes = C * T * N * x.dtype.itemsize
    Nb = _pick_batch_block(B, per_batch_bytes)
    grid = (B // Nb,)

    return pl.pallas_call(
        _spatio_conv_kernel,
        out_shape=jax.ShapeDtypeStruct((B, C, T, N), x.dtype),
        grid_spec=pltpu.PrefetchScalarGridSpec(
            num_scalar_prefetch=0,
            grid=grid,
            in_specs=[
                pl.BlockSpec((Nb, C, T, N), lambda nb: (nb, 0, 0, 0)),
                pl.BlockSpec((ks, N, N), lambda nb: (0, 0, 0)),
                pl.BlockSpec(memory_space=pltpu.MemorySpace.SMEM),
                pl.BlockSpec(memory_space=pltpu.MemorySpace.SMEM),
            ],
            out_specs=pl.BlockSpec((Nb, C, T, N), lambda nb: (nb, 0, 0, 0)),
        ),
        compiler_params=pltpu.CompilerParams(
            dimension_semantics=("parallel",),
            vmem_limit_bytes=32 * 1024 * 1024,
        ),
    )(x, lkt, th_flat, b_flat)


def _reference(x, Lk, theta, b):
    # Pure-JAX reference matching the PyTorch forward exactly.
    x_c = jnp.einsum('knm,bitm->bitkn', Lk, x)
    x_gc = jnp.einsum('iok,bitkn->botn', theta, x_c) + b
    return jax.nn.relu(x_gc + x)


if __name__ == "__main__":
    key = jax.random.PRNGKey(0)
    k_x, k_l, k_t, k_b = jax.random.split(key, 4)

    # Small but TPU-friendly shapes: 4 batches, 4 channels, 16 timesteps,
    # 128 graph nodes (lane-dense), Chebyshev order 3.
    B, C, T, N, ks = 4, 4, 16, 128, 3

    x = jax.random.normal(k_x, (B, C, T, N), dtype=jnp.float32)
    Lk = jax.random.normal(k_l, (ks, N, N), dtype=jnp.float32) * (1.0 / N) ** 0.5
    theta = jax.random.normal(k_t, (C, C, ks), dtype=jnp.float32) * (1.0 / (C * ks)) ** 0.5
    b = jax.random.normal(k_b, (1, C, 1, 1), dtype=jnp.float32) * 0.1

    out = spatio_conv_layer(x, Lk, theta, b)
    out = jax.block_until_ready(out)

    ref = _reference(x, Lk, theta, b)
    assert out.shape == (B, C, T, N), out.shape
    assert jnp.allclose(out, ref, atol=1e-4, rtol=1e-4), float(jnp.max(jnp.abs(out - ref)))

    print("KERNEL_OK")
</pallas_src>

<mosaic_0001>
module attributes {stable_mosaic.version = 11 : i64} {
  func.func @_spatio_conv_kernel(%arg0: i32, %arg1: memref<2x4x16x128xf32, #tpu.memory_space<vmem>>, %arg2: memref<3x128x128xf32, #tpu.memory_space<vmem>>, %arg3: memref<48xf32, #tpu.memory_space<smem>>, %arg4: memref<4xf32, #tpu.memory_space<smem>>, %arg5: memref<2x4x16x128xf32, #tpu.memory_space<vmem>>) attributes {dimension_semantics = [#tpu.dimension_semantics<parallel>], iteration_bounds = array<i64: 2>, scalar_prefetch = 0 : i64, scratch_operands = 0 : i64, tpu.core_type = #tpu.core_type<tc>, window_params = [{transform_indices = @transform_0, window_bounds = array<i64: 2, 4, 16, 128>}, {pipeline_mode = #tpu.pipeline_mode<synchronous>, transform_indices = @transform_1, window_bounds = array<i64: 3, 128, 128>}, {transform_indices = @transform_2, window_bounds = array<i64: 48>}, {transform_indices = @transform_3, window_bounds = array<i64: 4>}, {transform_indices = @transform_4, window_bounds = array<i64: 2, 4, 16, 128>}]} {
    %c0 = arith.constant 0 : index
    %c0_0 = arith.constant 0 : index
    %c0_1 = arith.constant 0 : index
    %c0_2 = arith.constant 0 : index
    %0 = vector.load %arg1[%c0, %c0_0, %c0_1, %c0_2] : memref<2x4x16x128xf32, #tpu.memory_space<vmem>>, vector<2x4x16x128xf32>
    %1 = vector.shape_cast %0 : vector<2x4x16x128xf32> to vector<128x128xf32>
    %2 = vector.extract_strided_slice %0 {offsets = [0, 0, 0, 0], sizes = [2, 1, 16, 128], strides = [1, 1, 1, 1]} : vector<2x4x16x128xf32> to vector<2x1x16x128xf32>
    %3 = vector.shape_cast %2 : vector<2x1x16x128xf32> to vector<2x16x128xf32>
    %c0_3 = arith.constant 0 : index
    %4 = memref.load %arg4[%c0_3] : memref<4xf32, #tpu.memory_space<smem>>
    %5 = vector.broadcast %4 : f32 to vector<2x16x128xf32>
    %6 = arith.addf %3, %5 : vector<2x16x128xf32>
    %7 = vector.extract_strided_slice %0 {offsets = [0, 1, 0, 0], sizes = [2, 1, 16, 128], strides = [1, 1, 1, 1]} : vector<2x4x16x128xf32> to vector<2x1x16x128xf32>
    %8 = vector.shape_cast %7 : vector<2x1x16x128xf32> to vector<2x16x128xf32>
    %c1 = arith.constant 1 : index
    %9 = memref.load %arg4[%c1] : memref<4xf32, #tpu.memory_space<smem>>
    %10 = vector.broadcast %9 : f32 to vector<2x16x128xf32>
    %11 = arith.addf %8, %10 : vector<2x16x128xf32>
    %12 = vector.extract_strided_slice %0 {offsets = [0, 2, 0, 0], sizes = [2, 1, 16, 128], strides = [1, 1, 1, 1]} : vector<2x4x16x128xf32> to vector<2x1x16x128xf32>
    %13 = vector.shape_cast %12 : vector<2x1x16x128xf32> to vector<2x16x128xf32>
    %c2 = arith.constant 2 : index
    %14 = memref.load %arg4[%c2] : memref<4xf32, #tpu.memory_space<smem>>
    %15 = vector.broadcast %14 : f32 to vector<2x16x128xf32>
    %16 = arith.addf %13, %15 : vector<2x16x128xf32>
    %17 = vector.extract_strided_slice %0 {offsets = [0, 3, 0, 0], sizes = [2, 1, 16, 128], strides = [1, 1, 1, 1]} : vector<2x4x16x128xf32> to vector<2x1x16x128xf32>
    %18 = vector.shape_cast %17 : vector<2x1x16x128xf32> to vector<2x16x128xf32>
    %c3 = arith.constant 3 : index
    %19 = memref.load %arg4[%c3] : memref<4xf32, #tpu.memory_space<smem>>
    %20 = vector.broadcast %19 : f32 to vector<2x16x128xf32>
    %21 = arith.addf %18, %20 : vector<2x16x128xf32>
    %c0_4 = arith.constant 0 : index
    %c0_5 = arith.constant 0 : index
    %c0_6 = arith.constant 0 : index
    %22 = vector.load %arg2[%c0_4, %c0_5, %c0_6] : memref<3x128x128xf32, #tpu.memory_space<vmem>>, vector<1x128x128xf32>
    %23 = vector.shape_cast %22 : vector<1x128x128xf32> to vector<128x128xf32>
    %cst = arith.constant dense<0.000000e+00> : vector<128x128xf32>
    %24 = tpu.matmul %1, %23, %cst {dimension_numbers = #tpu.dot_dimension_numbers<[1], [0], [0], [1], [0, 0, 1, 1], [], []>} : vector<128x128xf32>, vector<128x128xf32>, vector<128x128xf32> -> vector<128x128xf32>
    %25 = vector.shape_cast %24 : vector<128x128xf32> to vector<2x4x16x128xf32>
    %26 = vector.extract_strided_slice %25 {offsets = [0, 0, 0, 0], sizes = [2, 1, 16, 128], strides = [1, 1, 1, 1]} : vector<2x4x16x128xf32> to vector<2x1x16x128xf32>
    %27 = vector.shape_cast %26 : vector<2x1x16x128xf32> to vector<2x16x128xf32>
    %c0_7 = arith.constant 0 : index
    %28 = memref.load %arg3[%c0_7] : memref<48xf32, #tpu.memory_space<smem>>
    %29 = vector.broadcast %28 : f32 to vector<2x16x128xf32>
    %30 = arith.mulf %29, %27 : vector<2x16x128xf32>
    %31 = arith.addf %6, %30 : vector<2x16x128xf32>
    %c4 = arith.constant 4 : index
    %32 = memref.load %arg3[%c4] : memref<48xf32, #tpu.memory_space<smem>>
    %33 = vector.broadcast %32 : f32 to vector<2x16x128xf32>
    %34 = arith.mulf %33, %27 : vector<2x16x128xf32>
    %35 = arith.addf %11, %34 : vector<2x16x128xf32>
    %c8 = arith.constant 8 : index
    %36 = memref.load %arg3[%c8] : memref<48xf32, #tpu.memory_space<smem>>
    %37 = vector.broadcast %36 : f32 to vector<2x16x128xf32>
    %38 = arith.mulf %37, %27 : vector<2x16x128xf32>
    %39 = arith.addf %16, %38 : vector<2x16x128xf32>
    %c12 = arith.constant 12 : index
    %40 = memref.load %arg3[%c12] : memref<48xf32, #tpu.memory_space<smem>>
    %41 = vector.broadcast %40 : f32 to vector<2x16x128xf32>
    %42 = arith.mulf %41, %27 : vector<2x16x128xf32>
    %43 = arith.addf %21, %42 : vector<2x16x128xf32>
    %44 = vector.extract_strided_slice %25 {offsets = [0, 1, 0, 0], sizes = [2, 1, 16, 128], strides = [1, 1, 1, 1]} : vector<2x4x16x128xf32> to vector<2x1x16x128xf32>
    %45 = vector.shape_cast %44 : vector<2x1x16x128xf32> to vector<2x16x128xf32>
    %c1_8 = arith.constant 1 : index
    %46 = memref.load %arg3[%c1_8] : memref<48xf32, #tpu.memory_space<smem>>
    %47 = vector.broadcast %46 : f32 to vector<2x16x128xf32>
    %48 = arith.mulf %47, %45 : vector<2x16x128xf32>
    %49 = arith.addf %31, %48 : vector<2x16x128xf32>
    %c5 = arith.constant 5 : index
    %50 = memref.load %arg3[%c5] : memref<48xf32, #tpu.memory_space<smem>>
    %51 = vector.broadcast %50 : f32 to vector<2x16x128xf32>
    %52 = arith.mulf %51, %45 : vector<2x16x128xf32>
    %53 = arith.addf %35, %52 : vector<2x16x128xf32>
    %c9 = arith.constant 9 : index
    %54 = memref.load %arg3[%c9] : memref<48xf32, #tpu.memory_space<smem>>
    %55 = vector.broadcast %54 : f32 to vector<2x16x128xf32>
    %56 = arith.mulf %55, %45 : vector<2x16x128xf32>
    %57 = arith.addf %39, %56 : vector<2x16x128xf32>
    %c13 = arith.constant 13 : index
    %58 = memref.load %arg3[%c13] : memref<48xf32, #tpu.memory_space<smem>>
    %59 = vector.broadcast %58 : f32 to vector<2x16x128xf32>
    %60 = arith.mulf %59, %45 : vector<2x16x128xf32>
    %61 = arith.addf %43, %60 : vector<2x16x128xf32>
    %62 = vector.extract_strided_slice %25 {offsets = [0, 2, 0, 0], sizes = [2, 1, 16, 128], strides = [1, 1, 1, 1]} : vector<2x4x16x128xf32> to vector<2x1x16x128xf32>
    %63 = vector.shape_cast %62 : vector<2x1x16x128xf32> to vector<2x16x128xf32>
    %c2_9 = arith.constant 2 : index
    %64 = memref.load %arg3[%c2_9] : memref<48xf32, #tpu.memory_space<smem>>
    %65 = vector.broadcast %64 : f32 to vector<2x16x128xf32>
    %66 = arith.mulf %65, %63 : vector<2x16x128xf32>
    %67 = arith.addf %49, %66 : vector<2x16x128xf32>
    %c6 = arith.constant 6 : index
    %68 = memref.load %arg3[%c6] : memref<48xf32, #tpu.memory_space<smem>>
    %69 = vector.broadcast %68 : f32 to vector<2x16x128xf32>
    %70 = arith.mulf %69, %63 : vector<2x16x128xf32>
    %71 = arith.addf %53, %70 : vector<2x16x128xf32>
    %c10 = arith.constant 10 : index
    %72 = memref.load %arg3[%c10] : memref<48xf32, #tpu.memory_space<smem>>
    %73 = vector.broadcast %72 : f32 to vector<2x16x128xf32>
    %74 = arith.mulf %73, %63 : vector<2x16x128xf32>
    %75 = arith.addf %57, %74 : vector<2x16x128xf32>
    %c14 = arith.constant 14 : index
    %76 = memref.load %arg3[%c14] : memref<48xf32, #tpu.memory_space<smem>>
    %77 = vector.broadcast %76 : f32 to vector<2x16x128xf32>
    %78 = arith.mulf %77, %63 : vector<2x16x128xf32>
    %79 = arith.addf %61, %78 : vector<2x16x128xf32>
    %80 = vector.extract_strided_slice %25 {offsets = [0, 3, 0, 0], sizes = [2, 1, 16, 128], strides = [1, 1, 1, 1]} : vector<2x4x16x128xf32> to vector<2x1x16x128xf32>
    %81 = vector.shape_cast %80 : vector<2x1x16x128xf32> to vector<2x16x128xf32>
    %c3_10 = arith.constant 3 : index
    %82 = memref.load %arg3[%c3_10] : memref<48xf32, #tpu.memory_space<smem>>
    %83 = vector.broadcast %82 : f32 to vector<2x16x128xf32>
    %84 = arith.mulf %83, %81 : vector<2x16x128xf32>
    %85 = arith.addf %67, %84 : vector<2x16x128xf32>
    %c7 = arith.constant 7 : index
    %86 = memref.load %arg3[%c7] : memref<48xf32, #tpu.memory_space<smem>>
    %87 = vector.broadcast %86 : f32 to vector<2x16x128xf32>
    %88 = arith.mulf %87, %81 : vector<2x16x128xf32>
    %89 = arith.addf %71, %88 : vector<2x16x128xf32>
    %c11 = arith.constant 11 : index
    %90 = memref.load %arg3[%c11] : memref<48xf32, #tpu.memory_space<smem>>
    %91 = vector.broadcast %90 : f32 to vector<2x16x128xf32>
    %92 = arith.mulf %91, %81 : vector<2x16x128xf32>
    %93 = arith.addf %75, %92 : vector<2x16x128xf32>
    %c15 = arith.constant 15 : index
    %94 = memref.load %arg3[%c15] : memref<48xf32, #tpu.memory_space<smem>>
    %95 = vector.broadcast %94 : f32 to vector<2x16x128xf32>
    %96 = arith.mulf %95, %81 : vector<2x16x128xf32>
    %97 = arith.addf %79, %96 : vector<2x16x128xf32>
    %c1_11 = arith.constant 1 : index
    %c0_12 = arith.constant 0 : index
    %c0_13 = arith.constant 0 : index
    %98 = vector.load %arg2[%c1_11, %c0_12, %c0_13] : memref<3x128x128xf32, #tpu.memory_space<vmem>>, vector<1x128x128xf32>
    %99 = vector.shape_cast %98 : vector<1x128x128xf32> to vector<128x128xf32>
    %cst_14 = arith.constant dense<0.000000e+00> : vector<128x128xf32>
    %100 = tpu.matmul %1, %99, %cst_14 {dimension_numbers = #tpu.dot_dimension_numbers<[1], [0], [0], [1], [0, 0, 1, 1], [], []>} : vector<128x128xf32>, vector<128x128xf32>, vector<128x128xf32> -> vector<128x128xf32>
    %101 = vector.shape_cast %100 : vector<128x128xf32> to vector<2x4x16x128xf32>
    %102 = vector.extract_strided_slice %101 {offsets = [0, 0, 0, 0], sizes = [2, 1, 16, 128], strides = [1, 1, 1, 1]} : vector<2x4x16x128xf32> to vector<2x1x16x128xf32>
    %103 = vector.shape_cast %102 : vector<2x1x16x128xf32> to vector<2x16x128xf32>
    %c16 = arith.constant 16 : index
    %104 = memref.load %arg3[%c16] : memref<48xf32, #tpu.memory_space<smem>>
    %105 = vector.broadcast %104 : f32 to vector<2x16x128xf32>
    %106 = arith.mulf %105, %103 : vector<2x16x128xf32>
    %107 = arith.addf %85, %106 : vector<2x16x128xf32>
    %c20 = arith.constant 20 : index
    %108 = memref.load %arg3[%c20] : memref<48xf32, #tpu.memory_space<smem>>
    %109 = vector.broadcast %108 : f32 to vector<2x16x128xf32>
    %110 = arith.mulf %109, %103 : vector<2x16x128xf32>
    %111 = arith.addf %89, %110 : vector<2x16x128xf32>
    %c24 = arith.constant 24 : index
    %112 = memref.load %arg3[%c24] : memref<48xf32, #tpu.memory_space<smem>>
    %113 = vector.broadcast %112 : f32 to vector<2x16x128xf32>
    %114 = arith.mulf %113, %103 : vector<2x16x128xf32>
    %115 = arith.addf %93, %114 : vector<2x16x128xf32>
    %c28 = arith.constant 28 : index
    %116 = memref.load %arg3[%c28] : memref<48xf32, #tpu.memory_space<smem>>
    %117 = vector.broadcast %116 : f32 to vector<2x16x128xf32>
    %118 = arith.mulf %117, %103 : vector<2x16x128xf32>
    %119 = arith.addf %97, %118 : vector<2x16x128xf32>
    %120 = vector.extract_strided_slice %101 {offsets = [0, 1, 0, 0], sizes = [2, 1, 16, 128], strides = [1, 1, 1, 1]} : vector<2x4x16x128xf32> to vector<2x1x16x128xf32>
    %121 = vector.shape_cast %120 : vector<2x1x16x128xf32> to vector<2x16x128xf32>
    %c17 = arith.constant 17 : index
    %122 = memref.load %arg3[%c17] : memref<48xf32, #tpu.memory_space<smem>>
    %123 = vector.broadcast %122 : f32 to vector<2x16x128xf32>
    %124 = arith.mulf %123, %121 : vector<2x16x128xf32>
    %125 = arith.addf %107, %124 : vector<2x16x128xf32>
    %c21 = arith.constant 21 : index
    %126 = memref.load %arg3[%c21] : memref<48xf32, #tpu.memory_space<smem>>
    %127 = vector.broadcast %126 : f32 to vector<2x16x128xf32>
    %128 = arith.mulf %127, %121 : vector<2x16x128xf32>
    %129 = arith.addf %111, %128 : vector<2x16x128xf32>
    %c25 = arith.constant 25 : index
    %130 = memref.load %arg3[%c25] : memref<48xf32, #tpu.memory_space<smem>>
    %131 = vector.broadcast %130 : f32 to vector<2x16x128xf32>
    %132 = arith.mulf %131, %121 : vector<2x16x128xf32>
    %133 = arith.addf %115, %132 : vector<2x16x128xf32>
    %c29 = arith.constant 29 : index
    %134 = memref.load %arg3[%c29] : memref<48xf32, #tpu.memory_space<smem>>
    %135 = vector.broadcast %134 : f32 to vector<2x16x128xf32>
    %136 = arith.mulf %135, %121 : vector<2x16x128xf32>
    %137 = arith.addf %119, %136 : vector<2x16x128xf32>
    %138 = vector.extract_strided_slice %101 {offsets = [0, 2, 0, 0], sizes = [2, 1, 16, 128], strides = [1, 1, 1, 1]} : vector<2x4x16x128xf32> to vector<2x1x16x128xf32>
    %139 = vector.shape_cast %138 : vector<2x1x16x128xf32> to vector<2x16x128xf32>
    %c18 = arith.constant 18 : index
    %140 = memref.load %arg3[%c18] : memref<48xf32, #tpu.memory_space<smem>>
    %141 = vector.broadcast %140 : f32 to vector<2x16x128xf32>
    %142 = arith.mulf %141, %139 : vector<2x16x128xf32>
    %143 = arith.addf %125, %142 : vector<2x16x128xf32>
    %c22 = arith.constant 22 : index
    %144 = memref.load %arg3[%c22] : memref<48xf32, #tpu.memory_space<smem>>
    %145 = vector.broadcast %144 : f32 to vector<2x16x128xf32>
    %146 = arith.mulf %145, %139 : vector<2x16x128xf32>
    %147 = arith.addf %129, %146 : vector<2x16x128xf32>
    %c26 = arith.constant 26 : index
    %148 = memref.load %arg3[%c26] : memref<48xf32, #tpu.memory_space<smem>>
    %149 = vector.broadcast %148 : f32 to vector<2x16x128xf32>
    %150 = arith.mulf %149, %139 : vector<2x16x128xf32>
    %151 = arith.addf %133, %150 : vector<2x16x128xf32>
    %c30 = arith.constant 30 : index
    %152 = memref.load %arg3[%c30] : memref<48xf32, #tpu.memory_space<smem>>
    %153 = vector.broadcast %152 : f32 to vector<2x16x128xf32>
    %154 = arith.mulf %153, %139 : vector<2x16x128xf32>
    %155 = arith.addf %137, %154 : vector<2x16x128xf32>
    %156 = vector.extract_strided_slice %101 {offsets = [0, 3, 0, 0], sizes = [2, 1, 16, 128], strides = [1, 1, 1, 1]} : vector<2x4x16x128xf32> to vector<2x1x16x128xf32>
    %157 = vector.shape_cast %156 : vector<2x1x16x128xf32> to vector<2x16x128xf32>
    %c19 = arith.constant 19 : index
    %158 = memref.load %arg3[%c19] : memref<48xf32, #tpu.memory_space<smem>>
    %159 = vector.broadcast %158 : f32 to vector<2x16x128xf32>
    %160 = arith.mulf %159, %157 : vector<2x16x128xf32>
    %161 = arith.addf %143, %160 : vector<2x16x128xf32>
    %c23 = arith.constant 23 : index
    %162 = memref.load %arg3[%c23] : memref<48xf32, #tpu.memory_space<smem>>
    %163 = vector.broadcast %162 : f32 to vector<2x16x128xf32>
    %164 = arith.mulf %163, %157 : vector<2x16x128xf32>
    %165 = arith.addf %147, %164 : vector<2x16x128xf32>
    %c27 = arith.constant 27 : index
    %166 = memref.load %arg3[%c27] : memref<48xf32, #tpu.memory_space<smem>>
    %167 = vector.broadcast %166 : f32 to vector<2x16x128xf32>
    %168 = arith.mulf %167, %157 : vector<2x16x128xf32>
    %169 = arith.addf %151, %168 : vector<2x16x128xf32>
    %c31 = arith.constant 31 : index
    %170 = memref.load %arg3[%c31] : memref<48xf32, #tpu.memory_space<smem>>
    %171 = vector.broadcast %170 : f32 to vector<2x16x128xf32>
    %172 = arith.mulf %171, %157 : vector<2x16x128xf32>
    %173 = arith.addf %155, %172 : vector<2x16x128xf32>
    %c2_15 = arith.constant 2 : index
    %c0_16 = arith.constant 0 : index
    %c0_17 = arith.constant 0 : index
    %174 = vector.load %arg2[%c2_15, %c0_16, %c0_17] : memref<3x128x128xf32, #tpu.memory_space<vmem>>, vector<1x128x128xf32>
    %175 = vector.shape_cast %174 : vector<1x128x128xf32> to vector<128x128xf32>
    %cst_18 = arith.constant dense<0.000000e+00> : vector<128x128xf32>
    %176 = tpu.matmul %1, %175, %cst_18 {dimension_numbers = #tpu.dot_dimension_numbers<[1], [0], [0], [1], [0, 0, 1, 1], [], []>} : vector<128x128xf32>, vector<128x128xf32>, vector<128x128xf32> -> vector<128x128xf32>
    %177 = vector.shape_cast %176 : vector<128x128xf32> to vector<2x4x16x128xf32>
    %178 = vector.extract_strided_slice %177 {offsets = [0, 0, 0, 0], sizes = [2, 1, 16, 128], strides = [1, 1, 1, 1]} : vector<2x4x16x128xf32> to vector<2x1x16x128xf32>
    %179 = vector.shape_cast %178 : vector<2x1x16x128xf32> to vector<2x16x128xf32>
    %c32 = arith.constant 32 : index
    %180 = memref.load %arg3[%c32] : memref<48xf32, #tpu.memory_space<smem>>
    %181 = vector.broadcast %180 : f32 to vector<2x16x128xf32>
    %182 = arith.mulf %181, %179 : vector<2x16x128xf32>
    %183 = arith.addf %161, %182 : vector<2x16x128xf32>
    %c36 = arith.constant 36 : index
    %184 = memref.load %arg3[%c36] : memref<48xf32, #tpu.memory_space<smem>>
    %185 = vector.broadcast %184 : f32 to vector<2x16x128xf32>
    %186 = arith.mulf %185, %179 : vector<2x16x128xf32>
    %187 = arith.addf %165, %186 : vector<2x16x128xf32>
    %c40 = arith.constant 40 : index
    %188 = memref.load %arg3[%c40] : memref<48xf32, #tpu.memory_space<smem>>
    %189 = vector.broadcast %188 : f32 to vector<2x16x128xf32>
    %190 = arith.mulf %189, %179 : vector<2x16x128xf32>
    %191 = arith.addf %169, %190 : vector<2x16x128xf32>
    %c44 = arith.constant 44 : index
    %192 = memref.load %arg3[%c44] : memref<48xf32, #tpu.memory_space<smem>>
    %193 = vector.broadcast %192 : f32 to vector<2x16x128xf32>
    %194 = arith.mulf %193, %179 : vector<2x16x128xf32>
    %195 = arith.addf %173, %194 : vector<2x16x128xf32>
    %196 = vector.extract_strided_slice %177 {offsets = [0, 1, 0, 0], sizes = [2, 1, 16, 128], strides = [1, 1, 1, 1]} : vector<2x4x16x128xf32> to vector<2x1x16x128xf32>
    %197 = vector.shape_cast %196 : vector<2x1x16x128xf32> to vector<2x16x128xf32>
    %c33 = arith.constant 33 : index
    %198 = memref.load %arg3[%c33] : memref<48xf32, #tpu.memory_space<smem>>
    %199 = vector.broadcast %198 : f32 to vector<2x16x128xf32>
    %200 = arith.mulf %199, %197 : vector<2x16x128xf32>
    %201 = arith.addf %183, %200 : vector<2x16x128xf32>
    %c37 = arith.constant 37 : index
    %202 = memref.load %arg3[%c37] : memref<48xf32, #tpu.memory_space<smem>>
    %203 = vector.broadcast %202 : f32 to vector<2x16x128xf32>
    %204 = arith.mulf %203, %197 : vector<2x16x128xf32>
    %205 = arith.addf %187, %204 : vector<2x16x128xf32>
    %c41 = arith.constant 41 : index
    %206 = memref.load %arg3[%c41] : memref<48xf32, #tpu.memory_space<smem>>
    %207 = vector.broadcast %206 : f32 to vector<2x16x128xf32>
    %208 = arith.mulf %207, %197 : vector<2x16x128xf32>
    %209 = arith.addf %191, %208 : vector<2x16x128xf32>
    %c45 = arith.constant 45 : index
    %210 = memref.load %arg3[%c45] : memref<48xf32, #tpu.memory_space<smem>>
    %211 = vector.broadcast %210 : f32 to vector<2x16x128xf32>
    %212 = arith.mulf %211, %197 : vector<2x16x128xf32>
    %213 = arith.addf %195, %212 : vector<2x16x128xf32>
    %214 = vector.extract_strided_slice %177 {offsets = [0, 2, 0, 0], sizes = [2, 1, 16, 128], strides = [1, 1, 1, 1]} : vector<2x4x16x128xf32> to vector<2x1x16x128xf32>
    %215 = vector.shape_cast %214 : vector<2x1x16x128xf32> to vector<2x16x128xf32>
    %c34 = arith.constant 34 : index
    %216 = memref.load %arg3[%c34] : memref<48xf32, #tpu.memory_space<smem>>
    %217 = vector.broadcast %216 : f32 to vector<2x16x128xf32>
    %218 = arith.mulf %217, %215 : vector<2x16x128xf32>
    %219 = arith.addf %201, %218 : vector<2x16x128xf32>
    %c38 = arith.constant 38 : index
    %220 = memref.load %arg3[%c38] : memref<48xf32, #tpu.memory_space<smem>>
    %221 = vector.broadcast %220 : f32 to vector<2x16x128xf32>
    %222 = arith.mulf %221, %215 : vector<2x16x128xf32>
    %223 = arith.addf %205, %222 : vector<2x16x128xf32>
    %c42 = arith.constant 42 : index
    %224 = memref.load %arg3[%c42] : memref<48xf32, #tpu.memory_space<smem>>
    %225 = vector.broadcast %224 : f32 to vector<2x16x128xf32>
    %226 = arith.mulf %225, %215 : vector<2x16x128xf32>
    %227 = arith.addf %209, %226 : vector<2x16x128xf32>
    %c46 = arith.constant 46 : index
    %228 = memref.load %arg3[%c46] : memref<48xf32, #tpu.memory_space<smem>>
    %229 = vector.broadcast %228 : f32 to vector<2x16x128xf32>
    %230 = arith.mulf %229, %215 : vector<2x16x128xf32>
    %231 = arith.addf %213, %230 : vector<2x16x128xf32>
    %232 = vector.extract_strided_slice %177 {offsets = [0, 3, 0, 0], sizes = [2, 1, 16, 128], strides = [1, 1, 1, 1]} : vector<2x4x16x128xf32> to vector<2x1x16x128xf32>
    %233 = vector.shape_cast %232 : vector<2x1x16x128xf32> to vector<2x16x128xf32>
    %c35 = arith.constant 35 : index
    %234 = memref.load %arg3[%c35] : memref<48xf32, #tpu.memory_space<smem>>
    %235 = vector.broadcast %234 : f32 to vector<2x16x128xf32>
    %236 = arith.mulf %235, %233 : vector<2x16x128xf32>
    %237 = arith.addf %219, %236 : vector<2x16x128xf32>
    %c39 = arith.constant 39 : index
    %238 = memref.load %arg3[%c39] : memref<48xf32, #tpu.memory_space<smem>>
    %239 = vector.broadcast %238 : f32 to vector<2x16x128xf32>
    %240 = arith.mulf %239, %233 : vector<2x16x128xf32>
    %241 = arith.addf %223, %240 : vector<2x16x128xf32>
    %c43 = arith.constant 43 : index
    %242 = memref.load %arg3[%c43] : memref<48xf32, #tpu.memory_space<smem>>
    %243 = vector.broadcast %242 : f32 to vector<2x16x128xf32>
    %244 = arith.mulf %243, %233 : vector<2x16x128xf32>
    %245 = arith.addf %227, %244 : vector<2x16x128xf32>
    %c47 = arith.constant 47 : index
    %246 = memref.load %arg3[%c47] : memref<48xf32, #tpu.memory_space<smem>>
    %247 = vector.broadcast %246 : f32 to vector<2x16x128xf32>
    %248 = arith.mulf %247, %233 : vector<2x16x128xf32>
    %249 = arith.addf %231, %248 : vector<2x16x128xf32>
    %cst_19 = arith.constant 0.000000e+00 : f32
    %250 = vector.broadcast %cst_19 : f32 to vector<2x16x128xf32>
    %251 = arith.maximumf %237, %250 : vector<2x16x128xf32>
    %c0_20 = arith.constant 0 : index
    %c0_21 = arith.constant 0 : index
    %c0_22 = arith.constant 0 : index
    %c0_23 = arith.constant 0 : index
    %252 = vector.load %arg5[%c0_20, %c0_21, %c0_22, %c0_23] : memref<2x4x16x128xf32, #tpu.memory_space<vmem>>, vector<2x1x16x128xf32>
    %253 = vector.shape_cast %252 : vector<2x1x16x128xf32> to vector<2x16x128xf32>
    %254 = vector.shape_cast %251 : vector<2x16x128xf32> to vector<2x1x16x128xf32>
    tpu.vector_store %arg5[%c0_20, %c0_21, %c0_22, %c0_23], %254 {strides = array<i32>} : memref<2x4x16x128xf32, #tpu.memory_space<vmem>>, vector<2x1x16x128xf32>,
    %cst_24 = arith.constant 0.000000e+00 : f32
    %255 = vector.broadcast %cst_24 : f32 to vector<2x16x128xf32>
    %256 = arith.maximumf %241, %255 : vector<2x16x128xf32>
    %c0_25 = arith.constant 0 : index
    %c1_26 = arith.constant 1 : index
    %c0_27 = arith.constant 0 : index
    %c0_28 = arith.constant 0 : index
    %257 = vector.load %arg5[%c0_25, %c1_26, %c0_27, %c0_28] : memref<2x4x16x128xf32, #tpu.memory_space<vmem>>, vector<2x1x16x128xf32>
    %258 = vector.shape_cast %257 : vector<2x1x16x128xf32> to vector<2x16x128xf32>
    %259 = vector.shape_cast %256 : vector<2x16x128xf32> to vector<2x1x16x128xf32>
    tpu.vector_store %arg5[%c0_25, %c1_26, %c0_27, %c0_28], %259 {strides = array<i32>} : memref<2x4x16x128xf32, #tpu.memory_space<vmem>>, vector<2x1x16x128xf32>,
    %cst_29 = arith.constant 0.000000e+00 : f32
    %260 = vector.broadcast %cst_29 : f32 to vector<2x16x128xf32>
    %261 = arith.maximumf %245, %260 : vector<2x16x128xf32>
    %c0_30 = arith.constant 0 : index
    %c2_31 = arith.constant 2 : index
    %c0_32 = arith.constant 0 : index
    %c0_33 = arith.constant 0 : index
    %262 = vector.load %arg5[%c0_30, %c2_31, %c0_32, %c0_33] : memref<2x4x16x128xf32, #tpu.memory_space<vmem>>, vector<2x1x16x128xf32>
    %263 = vector.shape_cast %262 : vector<2x1x16x128xf32> to vector<2x16x128xf32>
    %264 = vector.shape_cast %261 : vector<2x16x128xf32> to vector<2x1x16x128xf32>
    tpu.vector_store %arg5[%c0_30, %c2_31, %c0_32, %c0_33], %264 {strides = array<i32>} : memref<2x4x16x128xf32, #tpu.memory_space<vmem>>, vector<2x1x16x128xf32>,
    %cst_34 = arith.constant 0.000000e+00 : f32
    %265 = vector.broadcast %cst_34 : f32 to vector<2x16x128xf32>
    %266 = arith.maximumf %249, %265 : vector<2x16x128xf32>
    %c0_35 = arith.constant 0 : index
    %c3_36 = arith.constant 3 : index
    %c0_37 = arith.constant 0 : index
    %c0_38 = arith.constant 0 : index
    %267 = vector.load %arg5[%c0_35, %c3_36, %c0_37, %c0_38] : memref<2x4x16x128xf32, #tpu.memory_space<vmem>>, vector<2x1x16x128xf32>
    %268 = vector.shape_cast %267 : vector<2x1x16x128xf32> to vector<2x16x128xf32>
    %269 = vector.shape_cast %266 : vector<2x16x128xf32> to vector<2x1x16x128xf32>
    tpu.vector_store %arg5[%c0_35, %c3_36, %c0_37, %c0_38], %269 {strides = array<i32>} : memref<2x4x16x128xf32, #tpu.memory_space<vmem>>, vector<2x1x16x128xf32>,
    return
  }
  func.func @transform_0(%arg0: i32) -> (i32, i32, i32, i32) {
    %c0_i32 = arith.constant 0 : i32
    %c0_i32_0 = arith.constant 0 : i32
    %c0_i32_1 = arith.constant 0 : i32
    %c0_i32_2 = arith.constant 0 : i32
    return %arg0, %c0_i32, %c0_i32_0, %c0_i32_1 : i32, i32, i32, i32
  }
  func.func @transform_1(%arg0: i32) -> (i32, i32, i32) {
    %c0_i32 = arith.constant 0 : i32
    %c0_i32_0 = arith.constant 0 : i32
    %c0_i32_1 = arith.constant 0 : i32
    %c0_i32_2 = arith.constant 0 : i32
    return %c0_i32, %c0_i32_0, %c0_i32_1 : i32, i32, i32
  }
  func.func @transform_2(%arg0: i32) -> i32 {
    %c0_i32 = arith.constant 0 : i32
    %c0_i32_0 = arith.constant 0 : i32
    return %c0_i32 : i32
  }
  func.func @transform_3(%arg0: i32) -> i32 {
    %c0_i32 = arith.constant 0 : i32
    %c0_i32_0 = arith.constant 0 : i32
    return %c0_i32 : i32
  }
  func.func @transform_4(%arg0: i32) -> (i32, i32, i32, i32) {
    %c0_i32 = arith.constant 0 : i32
    %c0_i32_0 = arith.constant 0 : i32
    %c0_i32_1 = arith.constant 0 : i32
    %c0_i32_2 = arith.constant 0 : i32
    return %arg0, %c0_i32, %c0_i32_0, %c0_i32_1 : i32, i32, i32, i32
  }
}

</mosaic_0001>

<bundles_post_ra>
// kernel: tpu_custom_call.1
= control target key start
LH: loop header
LB: loop body
LE: loop exit
PB: predicated region body
PF: predicated region fallthrough
CT: control target
= control target key end

     0   :  { %s3408_s0 = inlined_call_operand.hbm [shape: f32[4,4,16,128], index: 0, kind: input, shape index: {}]   ;;  %s3409_s1 = inlined_call_operand.hbm [shape: f32[3,128,128], index: 1, kind: input, shape index: {}]   ;;  %s3410_s2 = inlined_call_operand.vmem [shape: f32[48], index: 2, kind: input, shape index: {}]   ;;  %s3411_s3 = inlined_call_operand.vmem [shape: f32[4], index: 3, kind: input, shape index: {}]   ;;  %s3412_s4 = inlined_call_operand.hbm [shape: f32[4,4,16,128], index: 4, kind: output, shape index: {}]  }
   0x1   :  { %3514 = sst [smem:[#allocation96_spill]] %s3408_s0 }
   0x2   :  { %3515 = sst [smem:[#allocation97_spill]] %s3409_s1 }
   0x3   :  { %3516 = sst [smem:[#allocation98_spill]] %s3410_s2 }
   0x4   :  { %3517 = sst [smem:[#allocation99_spill]] %s3411_s3 }
   0x5   :  { %3518 = sst [smem:[#allocation100_spill]] %s3412_s4 }
   0x6   :  { %9 = vsyncpa [#allocation3], 0 }
   0x7   :  { %11 = vsyncpa [#allocation3 + $0x1], 0 }
   0x8   :  { %12 = vsyncpa [#allocation7], 0 }
   0x9   :  { %13 = vsyncpa [#allocation5], 0 }
   0xa   :  { %14 = vsyncpa [#allocation10], 0 }
   0xb   :  { %15 = vsyncpa [#allocation4], 0 }
   0xc   :  { %17 = vsyncpa [#allocation4 + $0x1], 0  ;;  %s2168_s15 = smov 0   ;;  %s2170_s16 = smov 0  }
   0xd   :  { %s2172_s17 = smov 0   ;;  %s2174_s18 = smov 0  }
   0xe LB: > { %3519 = sst [smem:[#allocation17_spill]] %s2120_s15  ;;  %s2189_s19 = sadd.s32 4294967295, %s2132_s18   ;;  %s2132_s18 = sphi %s2174_s18, %s3730_s18   ;;  %s2128_s17 = sphi %s2172_s17, %s3733_s17   ;;  %s2124_s16 = sphi %s2170_s16, %s3732_s16   ;;  %s2120_s15 = sphi %s2168_s15, %s3731_s15  }
   0xf   : > { %3520 = sst [smem:[#allocation18_spill]] %s2124_s16  ;;  %s1421_s20 = sadd.s32 4294967294, %s2132_s18  }
  0x10   : > { %3521 = sst [smem:[#allocation19_spill]] %s2128_s17  ;;  %p43_p0 = scmp.ne.s32.totalorder %s2124_s16, %s2120_s15 }
  0x11   : > { %3522 = sst [smem:[#allocation20_spill]] %s2132_s18  ;;  %p3413_p1 = scmp.eq.s32.totalorder %s2189_s19, 0 }
  0x12   : > { %3523 = sst [smem:[#allocation21_spill]] %s2189_s19  ;;  %p136_p3 = scmp.eq.s32.totalorder %s1421_s20, 1 }
  0x13   : > { %p2198_p4 = por %p3413_p1, %p43_p0  ;;  %p1422_p5 = scmp.ge.s32.totalorder %s2132_s18, 1 }
  0x14   : > { %p2203_p6 = por %p136_p3, %p43_p0  ;;  %p143_p7 = scmp.lt.s32.totalorder %s2132_s18, 3 }
  0x15   : > { %s3524_s21 = scalar_select %p2198_p4, 1, 0 }
  0x16   : > { %s3525_s22 = scalar_select %p2203_p6, 1, 0 }
  0x17   : > { %p2208_p8 = pnand %p1422_p5, %p143_p7  ;;  %s2134_s24 = smov [#allocation6]  }
  0x18   : > { %3526 = sst [smem:[#allocation22_spill]] %s3525_s22  ;;  %s155_s25 = sshll.u32 %s2134_s24, 4  ;;  %s2212_s25 = int_to_ptr.vmem [resolvable:$true] %s155_s25 }
  0x19   : > { %p1901_p9 = pneg %p2208_p8  ;;  %s3528_s2 = sld [smem:[#allocation98_spill]] }
  0x1a   : > { %s3530_s3 = sld [smem:[#allocation99_spill]]  ;;  %s3531_s1 = sld [smem:[#allocation97_spill]] }
  0x1b   : > { %p2222_p11 = pnand %p1901_p9, %p3413_p1 }
  0x1d   : > { %p1968_p13 = pneg %p2222_p11 }
  0x1f   : > { %s169_s28 = sshll.u32 %s3528_s2, 4  ;;  %s2226_s28 = int_to_ptr.vmem [resolvable:$true] %s169_s28 }
  0x20   : > { %s180_s6 = sshll.u32 %s3530_s3, 4  ;;  %s1966_s9 = scalar_lea.hbm %s3531_s1, 6144  ;;  %s2231_s6 = int_to_ptr.vmem [resolvable:$true] %s180_s6 }
  0x21   : > { %p1967_p12 = scmp.ne.s32.totalorder %s3531_s1, %s1966_s9  ;;  %p1973_p5 = scmp.lt.u32.totalorder %s1966_s9, %s3531_s1 }
  0x23   : > { %p1969_p0 = pnand %p1968_p13, %p1967_p12 }
  0x25   : > { %p1970_p3 = pneg %p1969_p0 }
  0x27   : > { %p1975_p7 = pnand %p1973_p5, %p1970_p3 }
  0x29   : > { %1978 = shalt.err (!%p1975_p7)
}
  0x2a   : > { %s1979_s14 = scalar_lea.vmem %s2212_s25, 6144  ;;  %p1987_p2 = scmp.lt.s32.totalorder %s2212_s25, %s2212_s25 }
  0x2b   : > { %p1980_p9 = scmp.ne.s32.totalorder %s2212_s25, %s1979_s14  ;;  %p1988_p12 = scmp.lt.s32.totalorder %s1979_s14, %s1979_s14 }
  0x2d   : > { %p1982_p10 = pnand %p1980_p9, %p1968_p13  ;;  %p1989_p0 = por %p1988_p12, %p1987_p2 }
  0x2f   : > { %p1983_p1 = pneg %p1982_p10 }
  0x31   : > { %p1990_p6 = pnand %p1989_p0, %p1983_p1 }
  0x33   : > { %1993 = shalt.err (!%p1990_p6)
}
  0x34   : > { %s2135_s20 = smov 128   ;;  %s2136_s24 = smov 8  }
  0x35   : > { %1904 = dma.hbm_to_vmem [thread:$0]  (!%p2222_p11), %s3531_s1, 6144, %s2212_s25, [#allocation7], %s2135_s20, %s2135_s20, %s2136_s24  }
  0x36   : > { %s1994_s30 = scalar_lea.vmem %s2226_s28, 16  ;;  %p2002_p10 = scmp.lt.s32.totalorder %s2226_s28, %s2226_s28 }
  0x37   : > { %p1995_p2 = scmp.ne.s32.totalorder %s2226_s28, %s1994_s30  ;;  %p2003_p3 = scmp.lt.s32.totalorder %s1994_s30, %s1994_s30 }
  0x39   : > { %p1997_p1 = pnand %p1995_p2, %p1968_p13  ;;  %p2004_p5 = por %p2003_p3, %p2002_p10 }
  0x3b   : > { %p1998_p6 = pneg %p1997_p1 }
  0x3d   : > { %p2005_p7 = pnand %p2004_p5, %p1998_p6 }
  0x3f   : > { %2008 = shalt.err (!%p2005_p7)
}
  0x40   : > { %s2137_s5 = smov [#allocation8]   ;;  %s2009_s25 = scalar_lea.vmem %s2231_s6, 16 }
  0x41   : > { %1907 = dma.vmem_to_smem (!%p2222_p11), %s2226_s28, 16, %s2137_s5, [#allocation5]  }
  0x42   : > { %p2010_p9 = scmp.ne.s32.totalorder %s2231_s6, %s2009_s25  ;;  %p2017_p2 = scmp.lt.s32.totalorder %s2231_s6, %s2231_s6 }
  0x43   : > { %p2018_p1 = scmp.lt.s32.totalorder %s2009_s25, %s2009_s25 }
  0x44   : > { %p2012_p12 = pnand %p2010_p9, %p1968_p13 }
  0x45   : > { %p2019_p6 = por %p2018_p1, %p2017_p2 }
  0x46   : > { %p2013_p0 = pneg %p2012_p12 }
  0x48   : > { %p2020_p10 = pnand %p2019_p6, %p2013_p0 }
  0x4a   : > { %2023 = shalt.err (!%p2020_p10)
}
  0x4b   : > { %s2138_s7 = smov [#allocation9]   ;;  %s2284_s28 = sadd.s32 1, %s2132_s18  }
  0x4c   : > { %1910 = dma.vmem_to_smem (!%p2222_p11), %s2231_s6, 16, %s2138_s7, [#allocation10]  }
  0x4d   : > { %3532 = sst [smem:[#allocation23_spill]] %s2284_s28  ;;  %s27_s8 = ssub.s32 %s2132_s18, %s2284_s28 }
  0x4e   : > { %s30_s9 = sadd.s32 1, %s2128_s17  ;;  %p28_p13 = scmp.eq.s32.totalorder %s27_s8, 0 }
  0x4f   : > { %p37_p3 = scmp.ne.s32.totalorder %s2128_s17, %s2124_s16  ;;  %p38_p5 = scmp.eq.s32.totalorder %s2132_s18, 0 }
  0x50   : > { %p1922_p7 = scmp.lt.s32.totalorder %s2132_s18, 2  ;;  %p3534_p12 = scmp.eq.s32.totalorder %s2189_s19, 1 }
  0x51   : > { %s2294_s29 = scalar_select %p28_p13, %s2128_s17, %s30_s9  }
  0x52   : > { %p39_p9 = por %p38_p5, %p37_p3  ;;  %p2298_p0 = por %p3534_p12, %p37_p3 }
  0x53   : > { %3533 = sst [smem:[#allocation24_spill]] %s2294_s29  ;;  %s191_s11 = sand.u32 1, %s2128_s17  }
  0x54   : > { %s3535_s10 = scalar_select %p2298_p0, 1, 0 }
  0x55   : > { %s1506_s12 = sshll.u32 %s2132_s18, 11  ;;  %s1427_s6 = sshll.u32 %s191_s11, 7 }
  0x56   : > { %3536 = sst [smem:[#allocation25_spill]] %s3535_s10  ;;  %s3537_s0 = sld [smem:[#allocation96_spill]] }
  0x57   : > { %s195_s27 = scalar_lea.vmem [#allocation2], %s1427_s6  ;;  %p2309_p11 = pnand %p1922_p7, %p39_p9 }
  0x58   : > { %s203_s30 = sshll.u32 %s195_s27, 4  ;;  %s2315_s25 = scalar_lea.sflag [#allocation3], %s191_s11  ;;  %s2313_s30 = int_to_ptr.vmem [resolvable:$true] %s203_s30 }
  0x59   : > { %p2026_p1 = pneg %p2309_p11 }
  0x5c   : > { %s2307_s26 = scalar_lea.hbm %s3537_s0, %s1506_s12  ;;  %s2029_s12 = scalar_lea.hbm %s3537_s0, 4096 }
  0x5d   : > { %s2024_s7 = scalar_lea.hbm %s2307_s26, 2048  ;;  %p2030_p13 = scmp.lt.u32.totalorder %s2307_s26, %s3537_s0 }
  0x5e   : > { %p2025_p2 = scmp.ne.s32.totalorder %s2307_s26, %s2024_s7  ;;  %p2031_p3 = scmp.lt.u32.totalorder %s2029_s12, %s2024_s7 }
  0x5f   : > { %p2033_p7 = scmp.lt.u32.totalorder %s2024_s7, %s2307_s26 }
  0x60   : > { %p2027_p6 = pnand %p2026_p1, %p2025_p2  ;;  %p2032_p5 = por %p2031_p3, %p2030_p13 }
  0x62   : > { %p2028_p10 = pneg %p2027_p6  ;;  %p2034_p9 = por %p2033_p7, %p2032_p5 }
  0x64   : > { %p2035_p12 = pnand %p2034_p9, %p2028_p10 }
  0x66   : > { %2038 = shalt.err (!%p2035_p12)
}
  0x67   : > { %s2039_s11 = scalar_lea.vmem %s2313_s30, 2048  ;;  %s2139_s14 = smov [#allocation2]  }
  0x68   : > { %p2040_p2 = scmp.ne.s32.totalorder %s2313_s30, %s2039_s11  ;;  %s2044_s27 = sshll.u32 %s2139_s14, 4  ;;  %s2045_s27 = int_to_ptr.vmem [resolvable:$false] %s2044_s27 }
  0x69   : > { %s2046_s8 = scalar_lea.vmem %s2045_s27, 4096  ;;  %p2047_p4 = scmp.lt.s32.totalorder %s2313_s30, %s2045_s27 }
  0x6a   : > { %p2042_p6 = pnand %p2040_p2, %p2026_p1  ;;  %p2048_p13 = scmp.lt.s32.totalorder %s2046_s8, %s2039_s11 }
  0x6c   : > { %p2043_p0 = pneg %p2042_p6  ;;  %p2049_p3 = por %p2048_p13, %p2047_p4 }
  0x6e   : > { %p2050_p5 = pnand %p2049_p3, %p2043_p0 }
  0x70   : > { %2053 = shalt.err (!%p2050_p5)
}
  0x71   : > { %1914 = dma.hbm_to_vmem [thread:$0]  (!%p2309_p11), %s2307_s26, 2048, %s2313_s30, %s2315_s25, %s2135_s20, %s2135_s20, %s2136_s24  }
  0x72   : > { %215 = sbr.rel (%p2208_p8) target bundleno = 504 (0x1f8), region = 36 }
  0x79   : > { %s2349_s7 = sand.u32 1, %s2124_s16   ;;  %p3540_p4 = scmp.ne.s32.totalorder %s3524_s21, 0 }
  0x7a   : > { %3539 = sst [smem:[#allocation26_spill]] %s2349_s7  ;;  %s3416_s9 = sshll.u32 %s2349_s7, 7 }
  0x7b   : > { %s218_s12 = scalar_lea.sflag [#allocation3], %s2349_s7  ;;  %s2355_s5 = scalar_lea.vmem [#allocation2], %s3416_s9 }
  0x7c   : > { %2099 = dma.done.wait (%p3540_p4), %s218_s12, 2048  }
  0x7d   : > { %2101 = vsyncadd (%p3540_p4), %s218_s12, 4294965248  ;;  %p3541_p0 = scmp.eq.s32.totalorder %s2189_s19, 0 }
  0x7f   : > { %2103 = dma.done.wait (%p3541_p0), [#allocation7], 6144   ;;  %p3542_p8 = pmov %p3541_p0 }
  0x80   : > { %p3543_p11 = pmov %p3541_p0 }
  0x81   : > { %2105 = vsyncadd (%p3542_p8), [#allocation7], 4294961152 }
  0x82   : > { %2107 = dma.done.wait (%p3543_p11), [#allocation5], 16   ;;  %p3544_p1 = pmov %p3541_p0 }
  0x83   : > { %p3545_p10 = pmov %p3541_p0 }
  0x84   : > { %2109 = vsyncadd (%p3544_p1), [#allocation5], 4294967280 }
  0x85   : > { %2111 = dma.done.wait (%p3545_p10), [#allocation10], 16   ;;  %p3546_p7 = pmov %p3541_p0 }
  0x87   : > { %2113 = vsyncadd (%p3546_p7), [#allocation10], 4294967280 }
  0x88   : > { %238 = sfence }
  0x89   : > { %v301_v0 = vld [vmem:[#allocation6] sm:$0xff]  ;;  %v302_v1 = vld [vmem:[#allocation6 + $0x8] sm:$0xff]  ;;  %v303_v5 = vld [vmem:[#allocation6 + $0x10] sm:$0xff]  ;;  %s277_s21 = sld [smem:[#allocation9]]  ;;  %s1437_s23 = sld [smem:[#allocation9 + $0x1]] }
  0x8a   : > { %v623_v2 = vld [vmem:[#allocation6 + $0x80] sm:$0xff]  ;;  %v1773_v3 = vpack.c.bf16 %v302_v1, %v301_v0  ;;  %v624_v4 = vld [vmem:[#allocation6 + $0x88] sm:$0xff]  ;;  %v304_v6 = vld [vmem:[#allocation6 + $0x18] sm:$0xff]  ;;  %s2469_s20 = sld [smem:[#allocation9 + $0x2]]  ;;  %s2471_s24 = sld [smem:[#allocation9 + $0x3]] }
  0x8b   : > { %v1805_v7 = vpack.c.bf16 %v624_v4, %v623_v2  ;;  %v1777_v8 = vpack.c.bf16 %v304_v6, %v303_v5  ;;  %v625_v9 = vld [vmem:[#allocation6 + $0x90] sm:$0xff]  ;;  %v626_v10 = vld [vmem:[#allocation6 + $0x98] sm:$0xff]  ;;  %v305_v11 = vld [vmem:[#allocation6 + $0x20] sm:$0xff]  ;;  %s2473_s26 = sld [smem:[#allocation8]]  ;;  %s2475_s30 = sld [smem:[#allocation8 + $0x4]] }
  0x8c   : > { %1774 = vmatprep.subr.bf16.mxu0 %v1773_v3  ;;  %v1809_v12 = vpack.c.bf16 %v626_v10, %v625_v9  ;;  %v306_v13 = vld [vmem:[#allocation6 + $0x28] sm:$0xff]  ;;  %v627_v14 = vld [vmem:[#allocation6 + $0xa0] sm:$0xff]  ;;  %v307_v18 = vld [vmem:[#allocation6 + $0x30] sm:$0xff]  ;;  %s2477_s25 = sld [smem:[#allocation8 + $0x8]]  ;;  %s2479_s6 = sld [smem:[#allocation8 + $0xc]] }
  0x8d   : > { %v628_v15 = vld [vmem:[#allocation6 + $0xa8] sm:$0xff]  ;;  %1806 = vmatprep.subr.bf16.mxu1 %v1805_v7  ;;  %1776 = vmatpush3.bf16.msra.mxu0 %v1773_v3  ;;  %v1781_v16 = vpack.c.bf16 %v306_v13, %v305_v11  ;;  %v308_v19 = vld [vmem:[#allocation6 + $0x38] sm:$0xff]  ;;  %v629_v20 = vld [vmem:[#allocation6 + $0xb0] sm:$0xff]  ;;  %s2481_s13 = sld [smem:[#allocation8 + $0x10]]  ;;  %s2483_s11 = sld [smem:[#allocation8 + $0x14]] }
  0x8e   : > { %1808 = vmatpush3.bf16.msra.mxu1 %v1805_v7  ;;  %1778 = vmatprep.subr.bf16.mxu0 %v1777_v8  ;;  %v1813_v17 = vpack.c.bf16 %v628_v15, %v627_v14  ;;  %v630_v21 = vld [vmem:[#allocation6 + $0xb8] sm:$0xff]  ;;  %v1785_v22 = vpack.c.bf16 %v308_v19, %v307_v18  ;;  %v309_v24 = vld [vmem:[#allocation6 + $0x40] sm:$0xff]  ;;  %v310_v25 = vld [vmem:[#allocation6 + $0x48] sm:$0xff]  ;;  %s2485_s14 = sld [smem:[#allocation8 + $0x18]]  ;;  %s2487_s27 = sld [smem:[#allocation8 + $0x1c]] }
  0x8f   : > { %1810 = vmatprep.subr.bf16.mxu1 %v1809_v12  ;;  %v1817_v23 = vpack.c.bf16 %v630_v21, %v629_v20  ;;  %v2374_v26 = vld [vmem:[%s2355_s5] sm:$0xff]  ;;  %v632_v28 = vld [vmem:[#allocation6 + $0xc8] sm:$0xff]  ;;  %v1789_v29 = vpack.c.bf16 %v310_v25, %v309_v24  ;;  %v311_v31 = vld [vmem:[#allocation6 + $0x50] sm:$0xff]  ;;  %s2489_s8 = sld [smem:[#allocation8 + $0x1]]  ;;  %s2491_s12 = sld [smem:[#allocation8 + $0x5]]  ;;  %v278_v24 = vstv %s277_s21  ;;  %v284_v25 = vstv %s1437_s23 }
  0x90   : > { %v631_v27 = vld [vmem:[#allocation6 + $0xc0] sm:$0xff]  ;;  %1637 = vmatprep.mubr.f32.mxu0 %v2374_v26  ;;  %1693 = vmatprep.mubr.f32.mxu1 %v2374_v26  ;;  %v312_v32 = vld [vmem:[#allocation6 + $0x58] sm:$0xff]  ;;  %v633_v33 = vld [vmem:[#allocation6 + $0xd0] sm:$0xff]  ;;  %s2495_s9 = sld [smem:[#allocation8 + $0xd]]  ;;  %s2497_s0 = sld [smem:[#allocation8 + $0x11]] }
  0x91   : > { %1780 = vmatpush3.bf16.msra.mxu0 %v1777_v8  ;;  %v1821_v30 = vpack.c.bf16 %v632_v28, %v631_v27  ;;  %v634_v34 = vld [vmem:[#allocation6 + $0xd8] sm:$0xff]  ;;  %v1793_v35 = vpack.c.bf16 %v312_v32, %v311_v31  ;;  %v313_v37 = vld [vmem:[#allocation6 + $0x60] sm:$0xff]  ;;  %v314_v38 = vld [vmem:[#allocation6 + $0x68] sm:$0xff]  ;;  %s2499_s1 = sld [smem:[#allocation8 + $0x15]]  ;;  %s2501_s2 = sld [smem:[#allocation8 + $0x19]]  ;;  %v290_v27 = vstv %s2469_s20  ;;  %v296_v28 = vstv %s2471_s24 }
  0x92   : > { %1812 = vmatpush3.bf16.msra.mxu1 %v1809_v12  ;;  %1782 = vmatprep.subr.bf16.mxu0 %v1781_v16  ;;  %v1825_v36 = vpack.c.bf16 %v634_v34, %v633_v33  ;;  %v635_v39 = vld [vmem:[#allocation6 + $0xe0] sm:$0xff]  ;;  %v636_v40 = vld [vmem:[#allocation6 + $0xe8] sm:$0xff]  ;;  %v1797_v41 = vpack.c.bf16 %v314_v38, %v313_v37  ;;  %v315_v43 = vld [vmem:[#allocation6 + $0x70] sm:$0xff]  ;;  %s2503_s3 = sld [smem:[#allocation8 + $0x1d]]  ;;  %s2505_s29 = sld [smem:[#allocation8 + $0x2]] }
  0x93   : > { %1814 = vmatprep.subr.bf16.mxu1 %v1813_v17  ;;  %v1829_v42 = vpack.c.bf16 %v636_v40, %v635_v39  ;;  %v316_v44 = vld [vmem:[#allocation6 + $0x78] sm:$0xff]  ;;  %v637_v45 = vld [vmem:[#allocation6 + $0xf0] sm:$0xff]  ;;  %v945_v49 = vld [vmem:[#allocation6 + $0x100] sm:$0xff]  ;;  %s2507_s17 = sld [smem:[#allocation8 + $0x6]]  ;;  %s2509_s16 = sld [smem:[#allocation8 + $0xa]] }
  0x94   : > { %v638_v46 = vld [vmem:[#allocation6 + $0xf8] sm:$0xff]  ;;  %v1801_v47 = vpack.c.bf16 %v316_v44, %v315_v43  ;;  %v946_v50 = vld [vmem:[#allocation6 + $0x108] sm:$0xff]  ;;  %v947_v52 = vld [vmem:[#allocation6 + $0x110] sm:$0xff]  ;;  %s2511_s28 = sld [smem:[#allocation8 + $0xe]]  ;;  %s2513_s18 = sld [smem:[#allocation8 + $0x12]]  ;;  %v2604_v44 = vstv %s2473_s26 }
  0x95   : > { %1784 = vmatpush3.bf16.msra.mxu0 %v1781_v16  ;;  %v1833_v48 = vpack.c.bf16 %v638_v46, %v637_v45  ;;  %v1837_v51 = vpack.c.bf16 %v946_v50, %v945_v49  ;;  %v948_v53 = vld [vmem:[#allocation6 + $0x118] sm:$0xff]  ;;  %v2379_v54 = vld [vmem:[%s2355_s5 + $0x8] sm:$0xff]  ;;  %v2382_v55 = vld [vmem:[%s2355_s5 + $0x10] sm:$0xff]  ;;  %s2515_s22 = sld [smem:[#allocation8 + $0x16]]  ;;  %s2517_s15 = sld [smem:[#allocation8 + $0x1a]]  ;;  %3566 = vst [vmem:[#allocation46_spill] sm:$0xff] %v2604_v44  ;;  %v2607_v45 = vstv %s2475_s30  ;;  %v2610_v46 = vstv %s2477_s25 }
  0x96   : > { %1816 = vmatpush3.bf16.msra.mxu1 %v1813_v17  ;;  %1786 = vmatprep.subr.bf16.mxu0 %v1785_v22  ;;  %v1841_v56 = vpack.c.bf16 %v948_v53, %v947_v52  ;;  %v949_v57 = vld [vmem:[#allocation6 + $0x120] sm:$0xff]  ;;  %v950_v58 = vld [vmem:[#allocation6 + $0x128] sm:$0xff]  ;;  %v2387_v59 = vld [vmem:[%s2355_s5 + $0x18] sm:$0xff]  ;;  %s2519_s4 = sld [smem:[#allocation8 + $0x1e]]  ;;  %s2521_s10 = sld [smem:[#allocation8 + $0x3]]  ;;  %v2546_v31 = vadd.f32 %v284_v25, %v2382_v55  ;;  %3567 = vst [vmem:[#allocation47_spill] sm:$0xff] %v2607_v45  ;;  %v2623_v49 = vstv %s2483_s11  ;;  %v2626_v50 = vstv %s2485_s14 }
  0x97   : > { %1818 = vmatprep.subr.bf16.mxu1 %v1817_v23  ;;  %v2392_v60 = vld [vmem:[%s2355_s5 + $0x20] sm:$0xff]  ;;  %v1845_v61 = vpack.c.bf16 %v950_v58, %v949_v57  ;;  %v951_v62 = vld [vmem:[#allocation6 + $0x130] sm:$0xff]  ;;  %v952_v63 = vld [vmem:[#allocation6 + $0x138] sm:$0xff]  ;;  %s2523_s19 = sld [smem:[#allocation8 + $0x7]]  ;;  %s2525_s7 = sld [smem:[#allocation8 + $0xb]]  ;;  %v2549_v32 = vadd.f32 %v284_v25, %v2387_v59  ;;  %3568 = vst [vmem:[#allocation48_spill] sm:$0xff] %v2610_v46  ;;  %v2636_v52 = vstv %s2489_s8  ;;  %v2639_v53 = vstv %s2491_s12 }
  0x98   : > { %v2397_v0 = vld [vmem:[%s2355_s5 + $0x28] sm:$0xff]  ;;  %v2402_v1 = vld [vmem:[%s2355_s5 + $0x30] sm:$0xff]  ;;  %v1849_v2 = vpack.c.bf16 %v952_v63, %v951_v62  ;;  %v953_v3 = vld [vmem:[#allocation6 + $0x140] sm:$0xff]  ;;  %s2551_s21 = sld [smem:[#allocation8 + $0x20]]  ;;  %s2553_s23 = sld [smem:[#allocation8 + $0x24]]  ;;  %v2556_v33 = vadd.f32 %v290_v27, %v2392_v60  ;;  %3572 = vst [vmem:[#allocation52_spill] sm:$0xff] %v2623_v49  ;;  %v2655_v57 = vstv %s2499_s1  ;;  %v2658_v58 = vstv %s2501_s2 }
  0x99   : > { %1788 = vmatpush3.bf16.msra.mxu0 %v1785_v22  ;;  %v954_v4 = vld [vmem:[#allocation6 + $0x148] sm:$0xff]  ;;  %v2407_v5 = vld [vmem:[%s2355_s5 + $0x38] sm:$0xff]  ;;  %v2412_v6 = vld [vmem:[%s2355_s5 + $0x40] sm:$0xff]  ;;  %3547 = sst [smem:[#allocation27_spill]] %s2507_s17  ;;  %s2527_s17 = sld [smem:[#allocation8 + $0xf]]  ;;  %v2559_v34 = vadd.f32 %v290_v27, %v2397_v0  ;;  %3573 = vst [vmem:[#allocation53_spill] sm:$0xff] %v2626_v50  ;;  %v2674_v62 = vstv %s2509_s16 }
  0x9a   : > { %1820 = vmatpush3.bf16.msra.mxu1 %v1817_v23  ;;  %1790 = vmatprep.subr.bf16.mxu0 %v1789_v29  ;;  %v1853_v7 = vpack.c.bf16 %v954_v4, %v953_v3  ;;  %v955_v8 = vld [vmem:[#allocation6 + $0x150] sm:$0xff]  ;;  %v956_v9 = vld [vmem:[#allocation6 + $0x158] sm:$0xff]  ;;  %v2417_v10 = vld [vmem:[%s2355_s5 + $0x48] sm:$0xff]  ;;  %3548 = sst [smem:[#allocation28_spill]] %s2511_s28  ;;  %s2567_s20 = sld [smem:[#allocation8 + $0x28]]  ;;  %3577 = vst [vmem:[#allocation55_spill] sm:$0xff] %v2636_v52 }
  0x9b   : > { %1822 = vmatprep.subr.bf16.mxu1 %v1821_v30  ;;  %v2422_v11 = vld [vmem:[%s2355_s5 + $0x50] sm:$0xff]  ;;  %v1857_v12 = vpack.c.bf16 %v956_v9, %v955_v8  ;;  %v957_v13 = vld [vmem:[#allocation6 + $0x160] sm:$0xff]  ;;  %v958_v14 = vld [vmem:[#allocation6 + $0x168] sm:$0xff]  ;;  %3549 = sst [smem:[#allocation29_spill]] %s2513_s18  ;;  %s2531_s28 = sld [smem:[#allocation8 + $0x13]]  ;;  %v2575_v37 = vadd.f32 %v278_v24, %v2417_v10  ;;  %3579 = vst [vmem:[#allocation56_spill] sm:$0xff] %v2639_v53 }
  0x9c   : > { %v2427_v15 = vld [vmem:[%s2355_s5 + $0x58] sm:$0xff]  ;;  %v2432_v16 = vld [vmem:[%s2355_s5 + $0x60] sm:$0xff]  ;;  %v1861_v17 = vpack.c.bf16 %v958_v14, %v957_v13  ;;  %v959_v18 = vld [vmem:[#allocation6 + $0x170] sm:$0xff]  ;;  %3550 = sst [smem:[#allocation30_spill]] %s2515_s22  ;;  %s2533_s18 = sld [smem:[#allocation8 + $0x17]]  ;;  %v2578_v38 = vadd.f32 %v284_v25, %v2422_v11  ;;  %3585 = vst [vmem:[#allocation60_spill] sm:$0xff] %v2655_v57  ;;  %v2689_v3 = vstv %s2519_s4  ;;  %v2692_v4 = vstv %s2521_s10 }
  0x9d   : > { %1792 = vmatpush3.bf16.msra.mxu0 %v1789_v29  ;;  %v960_v19 = vld [vmem:[#allocation6 + $0x178] sm:$0xff]  ;;  %v2437_v20 = vld [vmem:[%s2355_s5 + $0x68] sm:$0xff]  ;;  %v2442_v21 = vld [vmem:[%s2355_s5 + $0x70] sm:$0xff]  ;;  %3551 = sst [smem:[#allocation31_spill]] %s2517_s15  ;;  %s2535_s22 = sld [smem:[#allocation8 + $0x1b]]  ;;  %v2540_v29 = vadd.f32 %v278_v24, %v2374_v26  ;;  %3557 = vst [vmem:[#allocation37_spill] sm:$0xff] %v2575_v37  ;;  %v2581_v39 = vadd.f32 %v284_v25, %v2427_v15  ;;  %v2588_v40 = vadd.f32 %v290_v27, %v2432_v16 }
  0x9e   : > { %1824 = vmatpush3.bf16.msra.mxu1 %v1821_v30  ;;  %1794 = vmatprep.subr.bf16.mxu0 %v1793_v35  ;;  %v1865_v22 = vpack.c.bf16 %v960_v19, %v959_v18  ;;  %v2447_v23 = vld [vmem:[%s2355_s5 + $0x78] sm:$0xff]  ;;  %s2493_s5 = sld [smem:[#allocation8 + $0x9]]  ;;  %s2537_s15 = sld [smem:[#allocation8 + $0x1f]]  ;;  %v2543_v30 = vadd.f32 %v278_v24, %v2379_v54  ;;  %3558 = vst [vmem:[#allocation38_spill] sm:$0xff] %v2578_v38  ;;  %3586 = vst [vmem:[#allocation61_spill] sm:$0xff] %v2658_v58 }
  0x9f   : > { %1826 = vmatprep.subr.bf16.mxu1 %v1825_v36  ;;  %3552 = sst [smem:[#allocation32_spill]] %s2551_s21  ;;  %s2569_s24 = sld [smem:[#allocation8 + $0x2c]]  ;;  %3559 = vst [vmem:[#allocation39_spill] sm:$0xff] %v2581_v39  ;;  %3562 = vst [vmem:[#allocation42_spill] sm:$0xff] %v2588_v40  ;;  %v2597_v43 = vadd.f32 %v296_v28, %v2447_v23 }
  0xa0   : > { %3553 = sst [smem:[#allocation33_spill]] %s2553_s23  ;;  %s2583_s23 = sld [smem:[#allocation8 + $0x21]]  ;;  %3592 = vst [vmem:[#allocation65_spill] sm:$0xff] %v2674_v62  ;;  %3601 = vst [vmem:[#allocation70_spill] sm:$0xff] %v2689_v3 }
  0xa1   : > { %1796 = vmatpush3.bf16.msra.mxu0 %v1793_v35  ;;  %v2565_v35 = vadd.f32 %v296_v28, %v2407_v5  ;;  %3554 = sst [smem:[#allocation34_spill]] %s2567_s20  ;;  %s2585_s20 = sld [smem:[#allocation8 + $0x25]]  ;;  %3565 = vst [vmem:[#allocation45_spill] sm:$0xff] %v2597_v43  ;;  %v2704_v8 = vstv %s2531_s28 }
  0xa2   : > { %1828 = vmatpush3.bf16.msra.mxu1 %v1825_v36  ;;  %1798 = vmatprep.subr.bf16.mxu0 %v1797_v41  ;;  %v2572_v36 = vadd.f32 %v278_v24, %v2412_v6  ;;  %s2617_s21 = sld [smem:[#allocation8 + $0x26]]  ;;  %s3575_s26 = sld [smem:[#allocation27_spill]]  ;;  %v2707_v9 = vstv %s2533_s18 }
  0xa3   : > { %1830 = vmatprep.subr.bf16.mxu1 %v1829_v42  ;;  %s2631_s30 = sld [smem:[#allocation8 + $0x2a]]  ;;  %s2633_s25 = sld [smem:[#allocation8 + $0x2e]] }
  0xa4   : > { %3556 = vst [vmem:[#allocation36_spill] sm:$0xff] %v2572_v36  ;;  %s3582_s11 = sld [smem:[#allocation31_spill]]  ;;  %s2647_s14 = sld [smem:[#allocation8 + $0x23]] }
  0xa5   : > { %1800 = vmatpush3.bf16.msra.mxu0 %v1797_v41  ;;  %3555 = sst [smem:[#allocation35_spill]] %s2569_s24  ;;  %v2591_v41 = vadd.f32 %v290_v27, %v2437_v20  ;;  %s2599_s24 = sld [smem:[#allocation8 + $0x29]] }
  0xa6   : > { %1832 = vmatpush3.bf16.msra.mxu1 %v1829_v42  ;;  %1802 = vmatprep.subr.bf16.mxu0 %v1801_v47  ;;  %3560 = sst [smem:[#allocation40_spill]] %s2583_s23  ;;  %v2594_v42 = vadd.f32 %v296_v28, %v2442_v21  ;;  %s2601_s23 = sld [smem:[#allocation8 + $0x2d]] }
  0xa7   : > { %1834 = vmatprep.subr.bf16.mxu1 %v1833_v48  ;;  %3561 = sst [smem:[#allocation41_spill]] %s2585_s20  ;;  %3563 = vst [vmem:[#allocation43_spill] sm:$0xff] %v2591_v41  ;;  %s2615_s20 = sld [smem:[#allocation8 + $0x22]] }
  0xa8   : > { %3564 = vst [vmem:[#allocation44_spill] sm:$0xff] %v2594_v42  ;;  %3570 = sst [smem:[#allocation50_spill]] %s2617_s21  ;;  %s3578_s21 = sld [smem:[#allocation29_spill]] }
  0xa9   : > { %1804 = vmatpush3.bf16.msra.mxu0 %v1801_v47  ;;  %v2613_v47 = vstv %s2479_s6  ;;  %s3576_s6 = sld [smem:[#allocation28_spill]]  ;;  %s2665_s8 = sld [smem:[#allocation8 + $0x2f]] }
  0xaa   : > { %1836 = vmatpush3.bf16.msra.mxu1 %v1833_v48  ;;  %1838 = vmatprep.subr.bf16.mxu0 %v1837_v51  ;;  %3569 = vst [vmem:[#allocation49_spill] sm:$0xff] %v2613_v47  ;;  %v2620_v48 = vstv %s2481_s13  ;;  %s3580_s13 = sld [smem:[#allocation30_spill]]  ;;  %s3591_s1 = sld [smem:[#allocation33_spill]]  ;;  %v2752_v25 = vstv %s2647_s14 }
  0xab   : > { %1869 = vmatprep.subr.bf16.mxu1 %v1837_v51  ;;  %3571 = vst [vmem:[#allocation51_spill] sm:$0xff] %v2620_v48  ;;  %s3593_s2 = sld [smem:[#allocation34_spill]]  ;;  %s3597_s12 = sld [smem:[#allocation40_spill]]  ;;  %v2734_v18 = vstv %s2599_s24  ;;  %3617 = vst [vmem:[#allocation85_spill] sm:$0xff] %v2752_v25 }
  0xac   : > { %1638 = vmatmul.mubr.f32.vlgmr.msra.gmra.mrb[0].mxu0 %v2379_v54  ;;  %s3602_s16 = sld [smem:[#allocation50_spill]]  ;;  %3611 = vst [vmem:[#allocation79_spill] sm:$0xff] %v2734_v18  ;;  %v2737_v19 = vstv %s2601_s23  ;;  %s3718_s4 = sld [smem:[#allocation26_spill]] }
  0xad   : > { %1694 = vmatmul.mubr.f32.vlgmr.msra.gmra.mrb[0].mxu1 %v2379_v54  ;;  %1840 = vmatpush3.bf16.msra.mxu0 %v1837_v51  ;;  %3612 = vst [vmem:[#allocation80_spill] sm:$0xff] %v2737_v19  ;;  %s3721_s18 = sld [smem:[#allocation21_spill]]  ;;  %s3722_s28 = sld [smem:[#allocation25_spill]] }
  0xae   : > { %1877 = vmatpush3.bf16.msra.mxu1 %v1837_v51  ;;  %1640 = vmatprep.mubr.f32.mxu0 %v2382_v55  ;;  %v2629_v51 = vstv %s2487_s27  ;;  %s2649_s27 = sld [smem:[#allocation8 + $0x27]]  ;;  %s2140_s24 = smov [#allocation11]  }
  0xaf   : > { %1696 = vmatprep.mubr.f32.mxu1 %v2382_v55  ;;  %1842 = vmatprep.subr.bf16.mxu0 %v1841_v56  ;;  %3574 = vst [vmem:[#allocation54_spill] sm:$0xff] %v2629_v51  ;;  %v2677_v63 = vstv %s3576_s6 }
  0xb0   : > { %1641 = vmatmul.mubr.f32.gmra.mrb[2].mxu0 %v2387_v59  ;;  %1870 = vmatprep.subr.bf16.mxu1 %v1841_v56  ;;  %3594 = vst [vmem:[#allocation66_spill] sm:$0xff] %v2677_v63  ;;  %v2719_v13 = vstv %s3591_s1 }
  0xb1   : > { %1697 = vmatmul.mubr.f32.gmra.mrb[2].mxu1 %v2387_v59  ;;  %1844 = vmatpush3.bf16.msra.mxu0 %v1841_v56  ;;  %3606 = vst [vmem:[#allocation74_spill] sm:$0xff] %v2719_v13  ;;  %v2722_v14 = vstv %s3593_s2 }
  0xb2   : > { %1878 = vmatpush3.bf16.msra.mxu1 %v1841_v56  ;;  %1643 = vmatprep.mubr.f32.mxu0 %v2392_v60  ;;  %v2652_v56 = vstv %s2497_s0  ;;  %s3589_s0 = sld [smem:[#allocation32_spill]]  ;;  %3607 = vst [vmem:[#allocation75_spill] sm:$0xff] %v2722_v14  ;;  %s1302_s23 = scalar_lea.sflag [#allocation4], %s3718_s4 }
  0xb3   : > { %1699 = vmatprep.mubr.f32.mxu1 %v2392_v60  ;;  %1846 = vmatprep.subr.bf16.mxu0 %v1845_v61  ;;  %3584 = vst [vmem:[#allocation59_spill] sm:$0xff] %v2652_v56  ;;  %p3724_p12 = scmp.ne.s32.totalorder %s3722_s28, 0 }
  0xb4   : > { %1644 = vmatmul.mubr.f32.gmra.mrb[4].mxu0 %v2397_v0  ;;  %1871 = vmatprep.subr.bf16.mxu1 %v1845_v61  ;;  %v2755_v27 = vstv %s2649_s27 }
  0xb5   : > { %1700 = vmatmul.mubr.f32.gmra.mrb[4].mxu1 %v2397_v0  ;;  %1848 = vmatpush3.bf16.msra.mxu0 %v1845_v61  ;;  %3618 = vst [vmem:[#allocation86_spill] sm:$0xff] %v2755_v27 }
  0xb6   : > { %1879 = vmatpush3.bf16.msra.mxu1 %v1845_v61  ;;  %1646 = vmatprep.mubr.f32.mxu0 %v2402_v1  ;;  %v2671_v61 = vstv %s3575_s26  ;;  %s2058_s26 = sshll.u32 %s2140_s24, 4  ;;  %s2059_s26 = int_to_ptr.vmem [resolvable:$false] %s2058_s26 }
  0xb7   : > { %1702 = vmatprep.mubr.f32.mxu1 %v2402_v1  ;;  %1850 = vmatprep.subr.bf16.mxu0 %v1849_v2  ;;  %3590 = vst [vmem:[#allocation64_spill] sm:$0xff] %v2671_v61 }
  0xb8   : > { %1647 = vmatmul.mubr.f32.gmra.mrb[6].mxu0 %v2407_v5  ;;  %1872 = vmatprep.subr.bf16.mxu1 %v1849_v2 }
  0xb9   : > { %1703 = vmatmul.mubr.f32.gmra.mrb[6].mxu1 %v2407_v5  ;;  %1852 = vmatpush3.bf16.msra.mxu0 %v1849_v2 }
  0xba   : > { %1880 = vmatpush3.bf16.msra.mxu1 %v1849_v2  ;;  %1649 = vmatprep.mubr.f32.mxu0 %v2412_v6  ;;  %v2686_v2 = vstv %s3582_s11 }
  0xbb   : > { %1705 = vmatprep.mubr.f32.mxu1 %v2412_v6  ;;  %1854 = vmatprep.subr.bf16.mxu0 %v1853_v7  ;;  %3600 = vst [vmem:[#allocation69_spill] sm:$0xff] %v2686_v2 }
  0xbc   : > { %1650 = vmatmul.mubr.f32.gmra.mrb[8].mxu0 %v2417_v10  ;;  %1873 = vmatprep.subr.bf16.mxu1 %v1853_v7 }
  0xbd   : > { %1706 = vmatmul.mubr.f32.gmra.mrb[8].mxu1 %v2417_v10  ;;  %1856 = vmatpush3.bf16.msra.mxu0 %v1853_v7 }
  0xbe   : > { %1881 = vmatpush3.bf16.msra.mxu1 %v1853_v7  ;;  %1652 = vmatprep.mubr.f32.mxu0 %v2422_v11  ;;  %v2701_v7 = vstv %s2527_s17 }
  0xbf   : > { %1708 = vmatprep.mubr.f32.mxu1 %v2422_v11  ;;  %1858 = vmatprep.subr.bf16.mxu0 %v1857_v12  ;;  %3604 = vst [vmem:[#allocation72_spill] sm:$0xff] %v2701_v7 }
  0xc0   : > { %1653 = vmatmul.mubr.f32.gmra.mrb[10].mxu0 %v2427_v15  ;;  %1874 = vmatprep.subr.bf16.mxu1 %v1857_v12 }
  0xc1   : > { %1709 = vmatmul.mubr.f32.gmra.mrb[10].mxu1 %v2427_v15  ;;  %1860 = vmatpush3.bf16.msra.mxu0 %v1857_v12 }
  0xc2   : > { %1882 = vmatpush3.bf16.msra.mxu1 %v1857_v12  ;;  %1655 = vmatprep.mubr.f32.mxu0 %v2432_v16  ;;  %v2716_v12 = vstv %s3589_s0 }
  0xc3   : > { %1711 = vmatprep.mubr.f32.mxu1 %v2432_v16  ;;  %1862 = vmatprep.subr.bf16.mxu0 %v1861_v17  ;;  %3605 = vst [vmem:[#allocation73_spill] sm:$0xff] %v2716_v12 }
  0xc4   : > { %1656 = vmatmul.mubr.f32.gmra.mrb[12].mxu0 %v2437_v20  ;;  %1875 = vmatprep.subr.bf16.mxu1 %v1861_v17 }
  0xc5   : > { %1712 = vmatmul.mubr.f32.gmra.mrb[12].mxu1 %v2437_v20  ;;  %1864 = vmatpush3.bf16.msra.mxu0 %v1861_v17 }
  0xc6   : > { %1883 = vmatpush3.bf16.msra.mxu1 %v1861_v17  ;;  %1658 = vmatprep.mubr.f32.mxu0 %v2442_v21 }
  0xc7   : > { %1714 = vmatprep.mubr.f32.mxu1 %v2442_v21  ;;  %1866 = vmatprep.subr.bf16.mxu0 %v1865_v22 }
  0xc8   : > { %1659 = vmatmul.mubr.f32.gmra.mrb[14].mxu0 %v2447_v23  ;;  %1876 = vmatprep.subr.bf16.mxu1 %v1865_v22 }
  0xc9   : > { %1715 = vmatmul.mubr.f32.gmra.mrb[14].mxu1 %v2447_v23  ;;  %1868 = vmatpush3.bf16.msra.mxu0 %v1865_v22 }
  0xca   : > { %1884 = vmatpush3.bf16.msra.mxu1 %v1865_v22  ;;  %1749 = vmatprep.mubr.f32.mxu0 %v2374_v26  ;;  %v2562_v26 = vadd.f32 %v296_v28, %v2402_v1  ;;  %v2746_v22 = vstv %s2631_s30  ;;  %s2060_s30 = scalar_lea.vmem %s2059_s26, 4096 }
  0xcb   : > { %1761 = vmatprep.mubr.f32.mxu1 %v2412_v6  ;;  %v2698_v6 = vstv %s2525_s7  ;;  %3615 = vst [vmem:[#allocation83_spill] sm:$0xff] %v2746_v22  ;;  %s3723_s7 = sld [smem:[#allocation100_spill]] }
  0xcc   : > { %1750 = vmatmul.mubr.f32.vlgmr.msra.gmra.mrb[16].mxu0 %v2379_v54  ;;  %v2642_v54 = vstv %s2493_s5  ;;  %s3599_s5 = sld [smem:[#allocation41_spill]]  ;;  %3603 = vst [vmem:[#allocation71_spill] sm:$0xff] %v2698_v6 }
  0xcd   : > { %1762 = vmatmul.mubr.f32.vlgmr.msra.gmra.mrb[16].mxu1 %v2417_v10  ;;  %1752 = vmatprep.mubr.f32.mxu0 %v2382_v55  ;;  %3581 = vst [vmem:[#allocation57_spill] sm:$0xff] %v2642_v54  ;;  %v2645_v55 = vstv %s2495_s9  ;;  %s2663_s9 = sld [smem:[#allocation8 + $0x2b]]  ;;  %v2710_v10 = vstv %s2535_s22 }
  0xce   : > { %1764 = vmatprep.mubr.f32.mxu1 %v2422_v11  ;;  %3583 = vst [vmem:[#allocation58_spill] sm:$0xff] %v2645_v55  ;;  %v2713_v11 = vstv %s2537_s15  ;;  %s3719_s15 = sshll.u32 %s3718_s4, 7 }
  0xcf   : > { %s3315_s17 = scalar_lea.vmem [#allocation11], %s3719_s15 }
  0xd0   : > { %1753 = vmatmul.mubr.f32.gmra.mrb[18].mxu0 %v2387_v59  ;;  %v2661_v59 = vstv %s2503_s3  ;;  %s3595_s3 = sld [smem:[#allocation35_spill]]  ;;  %s1316_s22 = sshll.u32 %s3315_s17, 4  ;;  %s3360_s22 = int_to_ptr.vmem [resolvable:$true] %s1316_s22 }
  0xd1   : > { %1765 = vmatmul.mubr.f32.gmra.mrb[18].mxu1 %v2427_v15  ;;  %1755 = vmatprep.mubr.f32.mxu0 %v2392_v60  ;;  %3587 = vst [vmem:[#allocation62_spill] sm:$0xff] %v2661_v59  ;;  %v2668_v60 = vstv %s2505_s29  ;;  %p2061_p13 = scmp.lt.s32.totalorder %s3360_s22, %s2059_s26 }
  0xd2   : > { %1767 = vmatprep.mubr.f32.mxu1 %v2432_v16  ;;  %3588 = vst [vmem:[#allocation63_spill] sm:$0xff] %v2668_v60  ;;  %v2728_v16 = vstv %s3597_s12  ;;  %v2731_v17 = vstv %s3599_s5 }
  0xd3   : > { %3609 = vst [vmem:[#allocation77_spill] sm:$0xff] %v2728_v16  ;;  %3610 = vst [vmem:[#allocation78_spill] sm:$0xff] %v2731_v17  ;;  %v2758_v28 = vstv %s2663_s9  ;;  %v2761_v17 = vstv %s2665_s8 }
  0xd4   : > { %1756 = vmatmul.mubr.f32.gmra.mrb[20].mxu0 %v2397_v0  ;;  %v2680_v0 = vstv %s3578_s21  ;;  %3619 = vst [vmem:[#allocation87_spill] sm:$0xff] %v2758_v28  ;;  %3620 = vst [vmem:[#allocation88_spill] sm:$0xff] %v2761_v17 }
  0xd5   : > { %1768 = vmatmul.mubr.f32.gmra.mrb[20].mxu1 %v2437_v20  ;;  %1758 = vmatprep.mubr.f32.mxu0 %v2402_v1  ;;  %3596 = vst [vmem:[#allocation67_spill] sm:$0xff] %v2680_v0  ;;  %v2683_v1 = vstv %s3580_s13  ;;  %v2740_v20 = vstv %s2615_s20  ;;  %s2054_s20 = scalar_lea.vmem %s3360_s22, 2048 }
  0xd6   : > { %1770 = vmatprep.mubr.f32.mxu1 %v2442_v21  ;;  %3598 = vst [vmem:[#allocation68_spill] sm:$0xff] %v2683_v1  ;;  %v2725_v15 = vstv %s3595_s3  ;;  %3613 = vst [vmem:[#allocation81_spill] sm:$0xff] %v2740_v20  ;;  %v2743_v21 = vstv %s3602_s16  ;;  %p2055_p9 = scmp.ne.s32.totalorder %s3360_s22, %s2054_s20  ;;  %p2062_p3 = scmp.lt.s32.totalorder %s2060_s30, %s2054_s20 }
  0xd7   : > { %3608 = vst [vmem:[#allocation76_spill] sm:$0xff] %v2725_v15  ;;  %3614 = vst [vmem:[#allocation82_spill] sm:$0xff] %v2743_v21 }
  0xd8   : > { %1759 = vmatmul.mubr.f32.gmra.mrb[22].mxu0 %v2407_v5  ;;  %v2695_v5 = vstv %s2523_s19  ;;  %s1508_s19 = sshll.u32 %s3721_s18, 11  ;;  %p2056_p2 = pnand %p2055_p9, %p3724_p12 }
  0xd9   : > { %1771 = vmatmul.mubr.f32.gmra.mrb[22].mxu1 %v2447_v23  ;;  %v2749_v23 = vstv %s2633_s25  ;;  %s3358_s21 = scalar_lea.hbm %s3723_s7, %s1508_s19  ;;  %p2063_p5 = por %p2062_p3, %p2061_p13 }
  0xda   : > { %3616 = vst [vmem:[#allocation84_spill] sm:$0xff] %v2749_v23  ;;  %p2057_p6 = pneg %p2056_p2 }
  0xdc   : > { %p2064_p4 = pnand %p2063_p5, %p2057_p6 }
 0x17f   : > { %v1639_v24 = vpop.f32.mrb[0].mxu0 }
 0x180   : > { %v465_v18 = vmul.f32 %v1639_v24, %v2604_v44  ;;  %v475_v19 = vmul.f32 %v1639_v24, %v2607_v45  ;;  %v485_v20 = vmul.f32 %v1639_v24, %v2610_v46  ;;  %v495_v21 = vmul.f32 %v1639_v24, %v2613_v47  ;;  %v1695_v22 = vpop.f32.mrb[0].mxu1  ;;  %v383_v16 = vpop.f32.mrb[1].mxu0 }
 0x181   : > { %v2768_v23 = vmul.f32 %v1695_v22, %v2620_v48  ;;  %v2771_v25 = vmul.f32 %v1695_v22, %v2623_v49  ;;  %v2774_v28 = vmul.f32 %v1695_v22, %v2626_v50  ;;  %v2777_v17 = vmul.f32 %v1695_v22, %v2629_v51  ;;  %v705_v27 = vpop.f32.mrb[1].mxu1 }
 0x182   : > { %v469_v15 = vadd.f32 %v465_v18, %v2543_v30  ;;  %v479_v14 = vadd.f32 %v475_v19, %v2549_v32  ;;  %v489_v24 = vadd.f32 %v485_v20, %v2559_v34  ;;  %v499_v13 = vadd.f32 %v495_v21, %v2565_v35 }
 0x183   : > { %v464_v12 = vmul.f32 %v2604_v44, %v383_v16  ;;  %v474_v42 = vmul.f32 %v2607_v45, %v383_v16  ;;  %v484_v40 = vmul.f32 %v2610_v46, %v383_v16  ;;  %v494_v38 = vmul.f32 %v2613_v47, %v383_v16  ;;  %v1642_v36 = vpop.f32.mrb[2].mxu0 }
 0x184   : > { %v2788_v22 = vmul.f32 %v2620_v48, %v705_v27  ;;  %v2791_v30 = vmul.f32 %v2623_v49, %v705_v27  ;;  %v2794_v32 = vmul.f32 %v2626_v50, %v705_v27  ;;  %v2797_v34 = vmul.f32 %v2629_v51, %v705_v27  ;;  %v1698_v35 = vpop.f32.mrb[2].mxu1  ;;  %v393_v18 = vpop.f32.mrb[3].mxu0 }
 0x185   : > { %v468_v19 = vadd.f32 %v464_v12, %v2540_v29  ;;  %v478_v20 = vadd.f32 %v474_v42, %v2546_v31  ;;  %v488_v16 = vadd.f32 %v484_v40, %v2556_v33  ;;  %v498_v21 = vadd.f32 %v494_v38, %v2562_v26  ;;  %v715_v48 = vpop.f32.mrb[3].mxu1 }
 0x186   : > { %v505_v49 = vmul.f32 %v1642_v36, %v2636_v52  ;;  %v515_v43 = vmul.f32 %v1642_v36, %v2639_v53  ;;  %v525_v50 = vmul.f32 %v1642_v36, %v2642_v54  ;;  %v535_v27 = vmul.f32 %v1642_v36, %v2645_v55 }
 0x187   : > { %v2808_v51 = vmul.f32 %v1698_v35, %v2652_v56  ;;  %v2811_v29 = vmul.f32 %v1698_v35, %v2655_v57  ;;  %v2814_v31 = vmul.f32 %v1698_v35, %v2658_v58  ;;  %v2817_v33 = vmul.f32 %v1698_v35, %v2661_v59  ;;  %v1645_v26 = vpop.f32.mrb[4].mxu0 }
 0x188   : > { %v509_v38 = vadd.f32 %v505_v49, %v469_v15  ;;  %v519_v40 = vadd.f32 %v515_v43, %v479_v14  ;;  %v529_v42 = vadd.f32 %v525_v50, %v489_v24  ;;  %v539_v12 = vadd.f32 %v535_v27, %v499_v13  ;;  %v1701_v41 = vpop.f32.mrb[4].mxu1  ;;  %v403_v39 = vpop.f32.mrb[5].mxu0 }
 0x189   : > { %v504_v36 = vmul.f32 %v2636_v52, %v393_v18  ;;  %v514_v37 = vmul.f32 %v2639_v53, %v393_v18  ;;  %v524_v47 = vmul.f32 %v2642_v54, %v393_v18  ;;  %v534_v46 = vmul.f32 %v2645_v55, %v393_v18  ;;  %v725_v45 = vpop.f32.mrb[5].mxu1 }
 0x18a   : > { %v2824_v44 = vmul.f32 %v2652_v56, %v715_v48  ;;  %v2827_v35 = vmul.f32 %v2655_v57, %v715_v48  ;;  %v2830_v43 = vmul.f32 %v2658_v58, %v715_v48  ;;  %v2833_v49 = vmul.f32 %v2661_v59, %v715_v48 }
 0x18b   : > { %v508_v50 = vadd.f32 %v504_v36, %v468_v19  ;;  %v518_v13 = vadd.f32 %v514_v37, %v478_v20  ;;  %v528_v14 = vadd.f32 %v524_v47, %v488_v16  ;;  %v538_v15 = vadd.f32 %v534_v46, %v498_v21  ;;  %v1648_v24 = vpop.f32.mrb[6].mxu0 }
 0x18c   : > { %3621 = vst [vmem:[#allocation89_spill] sm:$0xff] %v2833_v49  ;;  %v545_v18 = vmul.f32 %v1645_v26, %v2668_v60  ;;  %v555_v27 = vmul.f32 %v1645_v26, %v2671_v61  ;;  %v565_v56 = vmul.f32 %v1645_v26, %v2674_v62  ;;  %v575_v57 = vmul.f32 %v1645_v26, %v2677_v63  ;;  %v1704_v55 = vpop.f32.mrb[6].mxu1  ;;  %v413_v54 = vpop.f32.mrb[7].mxu0 }
 0x18d   : > { %v2840_v58 = vmul.f32 %v1701_v41, %v2680_v0  ;;  %v2843_v48 = vmul.f32 %v1701_v41, %v2683_v1  ;;  %v2846_v37 = vmul.f32 %v1701_v41, %v2686_v2  ;;  %v2849_v46 = vmul.f32 %v1701_v41, %v2689_v3  ;;  %v2851_v47 = vpop.f32.mrb[7].mxu1 }
 0x18e   : > { %v549_v19 = vadd.f32 %v545_v18, %v509_v38  ;;  %v559_v20 = vadd.f32 %v555_v27, %v519_v40  ;;  %v569_v16 = vadd.f32 %v565_v56, %v529_v42  ;;  %v579_v21 = vadd.f32 %v575_v57, %v539_v12 }
 0x18f   : > { %v544_v26 = vmul.f32 %v2668_v60, %v403_v39  ;;  %v554_v36 = vmul.f32 %v2671_v61, %v403_v39  ;;  %v564_v59 = vmul.f32 %v2674_v62, %v403_v39  ;;  %v574_v53 = vmul.f32 %v2677_v63, %v403_v39  ;;  %v2857_v52 = vpop.f32.mrb[8].mxu0 }
 0x190   : > { %v2860_v49 = vmul.f32 %v2680_v0, %v725_v45  ;;  %v2863_v41 = vmul.f32 %v2683_v1, %v725_v45  ;;  %v2866_v38 = vmul.f32 %v2686_v2, %v725_v45  ;;  %v2869_v56 = vmul.f32 %v2689_v3, %v725_v45  ;;  %v2871_v57 = vpop.f32.mrb[8].mxu1  ;;  %v2873_v40 = vpop.f32.mrb[9].mxu0 }
 0x191   : > { %3622 = vst [vmem:[#allocation90_spill] sm:$0xff] %v2873_v40  ;;  %v548_v42 = vadd.f32 %v544_v26, %v508_v50  ;;  %v558_v39 = vadd.f32 %v554_v36, %v518_v13  ;;  %v568_v12 = vadd.f32 %v564_v59, %v528_v14  ;;  %v578_v18 = vadd.f32 %v574_v53, %v538_v15  ;;  %v2875_v27 = vpop.f32.mrb[9].mxu1 }
 0x192   : > { %3623 = vst [vmem:[#allocation91_spill] sm:$0xff] %v2875_v27  ;;  %v585_v0 = vmul.f32 %v1648_v24, %v2692_v4  ;;  %v595_v1 = vmul.f32 %v1648_v24, %v2695_v5  ;;  %v605_v2 = vmul.f32 %v1648_v24, %v2698_v6  ;;  %v615_v63 = vmul.f32 %v1648_v24, %v2701_v7 }
 0x193   : > { %v907_v45 = vmul.f32 %v1704_v55, %v2704_v8  ;;  %v917_v3 = vmul.f32 %v1704_v55, %v2707_v9  ;;  %v927_v62 = vmul.f32 %v1704_v55, %v2710_v10  ;;  %v937_v50 = vmul.f32 %v1704_v55, %v2713_v11  ;;  %v2885_v59 = vpop.f32.mrb[10].mxu0 }
 0x194   : > { %v589_v53 = vadd.f32 %v585_v0, %v549_v19  ;;  %v599_v13 = vadd.f32 %v595_v1, %v559_v20  ;;  %v609_v14 = vadd.f32 %v605_v2, %v569_v16  ;;  %v619_v15 = vadd.f32 %v615_v63, %v579_v21  ;;  %v2887_v26 = vpop.f32.mrb[10].mxu1  ;;  %v2889_v36 = vpop.f32.mrb[11].mxu0 }
 0x195   : > { %v584_v24 = vmul.f32 %v2692_v4, %v413_v54  ;;  %v594_v61 = vmul.f32 %v2695_v5, %v413_v54  ;;  %v604_v60 = vmul.f32 %v2698_v6, %v413_v54  ;;  %v614_v27 = vmul.f32 %v2701_v7, %v413_v54  ;;  %v2895_v40 = vpop.f32.mrb[11].mxu1 }
 0x196   : > { %v791_v55 = vadd.f32 %v2768_v23, %v589_v53  ;;  %v801_v0 = vadd.f32 %v2771_v25, %v599_v13  ;;  %v811_v63 = vadd.f32 %v2774_v28, %v609_v14  ;;  %v821_v1 = vadd.f32 %v2777_v17, %v619_v15  ;;  %v3630_v13 = vld [vmem:[#allocation48_spill] sm:$0xff]  ;;  %v3631_v15 = vld [vmem:[#allocation49_spill] sm:$0xff] }
 0x197   : > { %v588_v2 = vadd.f32 %v584_v24, %v548_v42  ;;  %v598_v19 = vadd.f32 %v594_v61, %v558_v39  ;;  %v608_v20 = vadd.f32 %v604_v60, %v568_v12  ;;  %v618_v16 = vadd.f32 %v614_v27, %v578_v18  ;;  %v2901_v21 = vpop.f32.mrb[12].mxu0  ;;  %v3624_v12 = vld [vmem:[#allocation89_spill] sm:$0xff] }
 0x198   : > { %v831_v6 = vadd.f32 %v2808_v51, %v791_v55  ;;  %v841_v54 = vadd.f32 %v2811_v29, %v801_v0  ;;  %v851_v7 = vadd.f32 %v2814_v31, %v811_v63  ;;  %v861_v23 = vadd.f32 %v2817_v33, %v821_v1  ;;  %v2907_v53 = vpop.f32.mrb[12].mxu1  ;;  %v2909_v25 = vpop.f32.mrb[13].mxu0 }
 0x199   : > { %v790_v17 = vadd.f32 %v2788_v22, %v588_v2  ;;  %v800_v61 = vadd.f32 %v2791_v30, %v598_v19  ;;  %v810_v60 = vadd.f32 %v2794_v32, %v608_v20  ;;  %v820_v28 = vadd.f32 %v2797_v34, %v618_v16  ;;  %v2915_v42 = vpop.f32.mrb[13].mxu1  ;;  %v3638_v20 = vld [vmem:[#allocation37_spill] sm:$0xff] }
 0x19a   : > { %v871_v51 = vadd.f32 %v2840_v58, %v831_v6  ;;  %v881_v29 = vadd.f32 %v2843_v48, %v841_v54  ;;  %v891_v31 = vadd.f32 %v2846_v37, %v851_v7  ;;  %v901_v33 = vadd.f32 %v2849_v46, %v861_v23  ;;  %v3639_v54 = vld [vmem:[#allocation39_spill] sm:$0xff] }
 0x19b   : > { %v830_v39 = vadd.f32 %v2824_v44, %v790_v17  ;;  %v840_v22 = vadd.f32 %v2827_v35, %v800_v61  ;;  %v850_v30 = vadd.f32 %v2830_v43, %v810_v60  ;;  %v860_v32 = vadd.f32 %v3624_v12, %v820_v28  ;;  %v2925_v18 = vpop.f32.mrb[14].mxu0  ;;  %v3640_v17 = vld [vmem:[#allocation43_spill] sm:$0xff]  ;;  %v3641_v61 = vld [vmem:[#allocation45_spill] sm:$0xff] }
 0x19c   : > { %v2927_v34 = vadd.f32 %v907_v45, %v871_v51  ;;  %v2929_v27 = vadd.f32 %v917_v3, %v881_v29  ;;  %v2931_v58 = vadd.f32 %v927_v62, %v891_v31  ;;  %v2933_v6 = vadd.f32 %v937_v50, %v901_v33  ;;  %v2935_v7 = vpop.f32.mrb[14].mxu1  ;;  %v2937_v48 = vpop.f32.mrb[15].mxu0  ;;  %v3628_v50 = vld [vmem:[#allocation46_spill] sm:$0xff]  ;;  %v3644_v31 = vld [vmem:[#allocation52_spill] sm:$0xff] }
 0x19d   : > { %v870_v44 = vadd.f32 %v2860_v49, %v830_v39  ;;  %v880_v35 = vadd.f32 %v2863_v41, %v840_v22  ;;  %v890_v43 = vadd.f32 %v2866_v38, %v850_v30  ;;  %v900_v37 = vadd.f32 %v2869_v56, %v860_v32  ;;  %v2943_v46 = vpop.f32.mrb[15].mxu1  ;;  %v3629_v38 = vld [vmem:[#allocation47_spill] sm:$0xff]  ;;  %v3643_v51 = vld [vmem:[#allocation51_spill] sm:$0xff]  ;;  %v3645_v39 = vld [vmem:[#allocation53_spill] sm:$0xff] }
 0x19e   : > { %3625 = vst [vmem:[#allocation89_spill] sm:$0xff] %v2929_v27  ;;  %3626 = vst [vmem:[#allocation92_spill] sm:$0xff] %v2931_v58  ;;  %v906_v62 = vmul.f32 %v2704_v8, %v2851_v47  ;;  %v916_v3 = vmul.f32 %v2707_v9, %v2851_v47  ;;  %v926_v45 = vmul.f32 %v2710_v10, %v2851_v47  ;;  %v3646_v30 = vld [vmem:[#allocation54_spill] sm:$0xff] }
 0x19f   : > { %3627 = vst [vmem:[#allocation93_spill] sm:$0xff] %v2933_v6  ;;  %v936_v49 = vmul.f32 %v2713_v11, %v2851_v47  ;;  %v467_v41 = vmul.f32 %v2857_v52, %v3628_v50  ;;  %v477_v56 = vmul.f32 %v2857_v52, %v3629_v38  ;;  %v487_v14 = vmul.f32 %v2857_v52, %v3630_v13  ;;  %v2961_v55 = vpop.f32.mrb[16].mxu0  ;;  %v3647_v32 = vld [vmem:[#allocation90_spill] sm:$0xff] }
 0x1a0   : > { %v497_v24 = vmul.f32 %v2857_v52, %v3631_v15  ;;  %v2963_v0 = vadd.f32 %v906_v62, %v870_v44  ;;  %v2965_v63 = vadd.f32 %v916_v3, %v880_v35  ;;  %v2967_v1 = vadd.f32 %v926_v45, %v890_v43  ;;  %v2971_v2 = vpop.f32.mrb[16].mxu1  ;;  %v2973_v19 = vpop.f32.mrb[17].mxu0  ;;  %v3649_v3 = vld [vmem:[#allocation91_spill] sm:$0xff] }
 0x1a1   : > { %v2969_v47 = vadd.f32 %v936_v49, %v900_v37  ;;  %3636 = vst [vmem:[#allocation94_spill] sm:$0xff] %v2971_v2  ;;  %3637 = vst [vmem:[#allocation95_spill] sm:$0xff] %v2973_v19  ;;  %v471_v16 = vadd.f32 %v467_v41, %v3638_v20  ;;  %v481_v23 = vadd.f32 %v477_v56, %v3639_v54  ;;  %v2979_v28 = vpop.f32.mrb[17].mxu1  ;;  %v3652_v56 = vld [vmem:[#allocation36_spill] sm:$0xff]  ;;  %v3655_v54 = vld [vmem:[#allocation44_spill] sm:$0xff] }
 0x1a2   : > { %3632 = vst [vmem:[#allocation46_spill] sm:$0xff] %v2963_v0  ;;  %3633 = vst [vmem:[#allocation47_spill] sm:$0xff] %v2965_v63  ;;  %v491_v52 = vadd.f32 %v487_v14, %v3640_v17  ;;  %v501_v60 = vadd.f32 %v497_v24, %v3641_v61  ;;  %v2983_v29 = vmul.f32 %v2871_v57, %v3643_v51  ;;  %v3653_v14 = vld [vmem:[#allocation38_spill] sm:$0xff]  ;;  %v3654_v24 = vld [vmem:[#allocation42_spill] sm:$0xff] }
 0x1a3   : > { %3634 = vst [vmem:[#allocation48_spill] sm:$0xff] %v2967_v1  ;;  %3635 = vst [vmem:[#allocation49_spill] sm:$0xff] %v2969_v47  ;;  %v2987_v33 = vmul.f32 %v2871_v57, %v3644_v31  ;;  %v2991_v22 = vmul.f32 %v2871_v57, %v3645_v39  ;;  %v2995_v12 = vmul.f32 %v2871_v57, %v3646_v30  ;;  %v3005_v62 = vpop.f32.mrb[18].mxu0 }
 0x1a4   : > { %3642 = vst [vmem:[#allocation37_spill] sm:$0xff] %v2979_v28  ;;  %v466_v44 = vmul.f32 %v3628_v50, %v3647_v32  ;;  %v476_v35 = vmul.f32 %v3629_v38, %v3647_v32  ;;  %v486_v43 = vmul.f32 %v3630_v13, %v3647_v32  ;;  %v496_v37 = vmul.f32 %v3631_v15, %v3647_v32  ;;  %v3023_v41 = vpop.f32.mrb[18].mxu1  ;;  %v3025_v38 = vpop.f32.mrb[19].mxu0  ;;  %v3659_v32 = vld [vmem:[#allocation57_spill] sm:$0xff] }
 0x1a5   : > { %3648 = vst [vmem:[#allocation39_spill] sm:$0xff] %v3005_v62  ;;  %v3009_v45 = vmul.f32 %v3643_v51, %v3649_v3  ;;  %v3013_v57 = vmul.f32 %v3644_v31, %v3649_v3  ;;  %v3017_v49 = vmul.f32 %v3645_v39, %v3649_v3  ;;  %v3021_v50 = vmul.f32 %v3646_v30, %v3649_v3  ;;  %v3031_v61 = vpop.f32.mrb[19].mxu1  ;;  %v3657_v51 = vld [vmem:[#allocation55_spill] sm:$0xff]  ;;  %v3658_v39 = vld [vmem:[#allocation56_spill] sm:$0xff] }
 0x1a6   : > { %3650 = vst [vmem:[#allocation43_spill] sm:$0xff] %v3023_v41  ;;  %3651 = vst [vmem:[#allocation45_spill] sm:$0xff] %v3025_v38  ;;  %v470_v13 = vadd.f32 %v466_v44, %v3652_v56  ;;  %v480_v15 = vadd.f32 %v476_v35, %v3653_v14  ;;  %v490_v20 = vadd.f32 %v486_v43, %v3654_v24  ;;  %v3660_v38 = vld [vmem:[#allocation58_spill] sm:$0xff]  ;;  %v3661_v56 = vld [vmem:[#allocation59_spill] sm:$0xff] }
 0x1a7   : > { %v500_v17 = vadd.f32 %v496_v37, %v3655_v54  ;;  %3656 = vst [vmem:[#allocation51_spill] sm:$0xff] %v3031_v61  ;;  %v507_v31 = vmul.f32 %v2885_v59, %v3657_v51  ;;  %v517_v30 = vmul.f32 %v2885_v59, %v3658_v39  ;;  %v527_v3 = vmul.f32 %v2885_v59, %v3659_v32  ;;  %v3662_v43 = vld [vmem:[#allocation60_spill] sm:$0xff]  ;;  %v3663_v14 = vld [vmem:[#allocation61_spill] sm:$0xff]  ;;  %v3664_v54 = vld [vmem:[#allocation62_spill] sm:$0xff]  ;;  %v3057_v41 = vpop.f32.mrb[20].mxu0 }
 0x1a8   : > { %v537_v44 = vmul.f32 %v2885_v59, %v3660_v38  ;;  %v3043_v35 = vmul.f32 %v2887_v26, %v3661_v56  ;;  %v3047_v37 = vmul.f32 %v2887_v26, %v3662_v43  ;;  %v3051_v24 = vmul.f32 %v2887_v26, %v3663_v14  ;;  %3665 = vst [vmem:[#allocation52_spill] sm:$0xff] %v3057_v41  ;;  %v3059_v1 = vpop.f32.mrb[20].mxu1  ;;  %v3061_v63 = vpop.f32.mrb[21].mxu0 }
 0x1a9   : > { %v3055_v61 = vmul.f32 %v2887_v26, %v3664_v54  ;;  %v511_v62 = vadd.f32 %v507_v31, %v471_v16  ;;  %v521_v59 = vadd.f32 %v517_v30, %v481_v23  ;;  %v531_v28 = vadd.f32 %v527_v3, %v491_v52  ;;  %3666 = vst [vmem:[#allocation53_spill] sm:$0xff] %v3059_v1  ;;  %v3071_v16 = vpop.f32.mrb[21].mxu1 }
 0x1aa   : > { %v541_v47 = vadd.f32 %v537_v44, %v501_v60  ;;  %3667 = vst [vmem:[#allocation54_spill] sm:$0xff] %v3061_v63  ;;  %v506_v0 = vmul.f32 %v3657_v51, %v2889_v36  ;;  %v516_v19 = vmul.f32 %v3658_v39, %v2889_v36  ;;  %v526_v26 = vmul.f32 %v3659_v32, %v2889_v36  ;;  %v3670_v32 = vld [vmem:[#allocation63_spill] sm:$0xff]  ;;  %v3671_v44 = vld [vmem:[#allocation64_spill] sm:$0xff] }
 0x1ab   : > { %v536_v41 = vmul.f32 %v3660_v38, %v2889_v36  ;;  %3668 = vst [vmem:[#allocation90_spill] sm:$0xff] %v3071_v16  ;;  %v3075_v23 = vmul.f32 %v3661_v56, %v2895_v40  ;;  %v3079_v52 = vmul.f32 %v3662_v43, %v2895_v40  ;;  %v3083_v60 = vmul.f32 %v3663_v14, %v2895_v40  ;;  %v3089_v30 = vpop.f32.mrb[22].mxu0  ;;  %v3672_v43 = vld [vmem:[#allocation65_spill] sm:$0xff]  ;;  %v3673_v16 = vld [vmem:[#allocation66_spill] sm:$0xff] }
 0x1ac   : > { %v3087_v51 = vmul.f32 %v3664_v54, %v2895_v40  ;;  %v510_v31 = vadd.f32 %v506_v0, %v470_v13  ;;  %v520_v36 = vadd.f32 %v516_v19, %v480_v15  ;;  %v530_v38 = vadd.f32 %v526_v26, %v490_v20  ;;  %3669 = vst [vmem:[#allocation91_spill] sm:$0xff] %v3089_v30  ;;  %v3099_v40 = vpop.f32.mrb[22].mxu1  ;;  %v3101_v0 = vpop.f32.mrb[23].mxu0  ;;  %v3676_v19 = vld [vmem:[#allocation67_spill] sm:$0xff]  ;;  %v3677_v13 = vld [vmem:[#allocation68_spill] sm:$0xff]  ;;  %v3678_v20 = vld [vmem:[#allocation69_spill] sm:$0xff] }
 0x1ad   : > { %v540_v39 = vadd.f32 %v536_v41, %v500_v17  ;;  %v547_v3 = vmul.f32 %v2901_v21, %v3670_v32  ;;  %v557_v56 = vmul.f32 %v2901_v21, %v3671_v44  ;;  %v567_v14 = vmul.f32 %v2901_v21, %v3672_v43  ;;  %3674 = vst [vmem:[#allocation36_spill] sm:$0xff] %v3099_v40  ;;  %v3679_v54 = vld [vmem:[#allocation70_spill] sm:$0xff]  ;;  %v3111_v30 = vpop.f32.mrb[23].mxu1 }
 0x1ae   : > { %v577_v63 = vmul.f32 %v2901_v21, %v3673_v16  ;;  %3675 = vst [vmem:[#allocation38_spill] sm:$0xff] %v3101_v0  ;;  %v869_v41 = vmul.f32 %v2907_v53, %v3676_v19  ;;  %v879_v15 = vmul.f32 %v2907_v53, %v3677_v13  ;;  %v889_v17 = vmul.f32 %v2907_v53, %v3678_v20 }
 0x1af   : > { %v899_v26 = vmul.f32 %v2907_v53, %v3679_v54  ;;  %v551_v1 = vadd.f32 %v547_v3, %v511_v62  ;;  %v561_v21 = vadd.f32 %v557_v56, %v521_v59  ;;  %v571_v2 = vadd.f32 %v567_v14, %v531_v28 }
 0x1b0   : > { %v581_v40 = vadd.f32 %v577_v63, %v541_v47  ;;  %v546_v0 = vmul.f32 %v3670_v32, %v2909_v25  ;;  %v556_v6 = vmul.f32 %v3671_v44, %v2909_v25  ;;  %v566_v58 = vmul.f32 %v3672_v43, %v2909_v25  ;;  %v3681_v43 = vld [vmem:[#allocation72_spill] sm:$0xff] }
 0x1b1   : > { %v576_v27 = vmul.f32 %v3673_v16, %v2909_v25  ;;  %v868_v53 = vmul.f32 %v3676_v19, %v2915_v42  ;;  %v878_v62 = vmul.f32 %v3677_v13, %v2915_v42  ;;  %v888_v63 = vmul.f32 %v3678_v20, %v2915_v42  ;;  %v3680_v16 = vld [vmem:[#allocation71_spill] sm:$0xff] }
 0x1b2   : > { %v898_v47 = vmul.f32 %v3679_v54, %v2915_v42  ;;  %v550_v28 = vadd.f32 %v546_v0, %v510_v31  ;;  %v560_v59 = vadd.f32 %v556_v6, %v520_v36  ;;  %v570_v32 = vadd.f32 %v566_v58, %v530_v38 }
 0x1b3   : > { %v580_v3 = vadd.f32 %v576_v27, %v540_v39  ;;  %v587_v44 = vmul.f32 %v2925_v18, %v2692_v4  ;;  %v597_v25 = vmul.f32 %v2925_v18, %v2695_v5  ;;  %v607_v56 = vmul.f32 %v2925_v18, %v3680_v16 }
 0x1b4   : > { %v617_v14 = vmul.f32 %v2925_v18, %v3681_v43  ;;  %v909_v19 = vmul.f32 %v2935_v7, %v2704_v8  ;;  %v919_v42 = vmul.f32 %v2935_v7, %v2707_v9  ;;  %v929_v27 = vmul.f32 %v2935_v7, %v2710_v10 }
 0x1b5   : > { %v939_v58 = vmul.f32 %v2935_v7, %v2713_v11  ;;  %v591_v6 = vadd.f32 %v587_v44, %v551_v1  ;;  %v601_v31 = vadd.f32 %v597_v25, %v561_v21  ;;  %v611_v36 = vadd.f32 %v607_v56, %v571_v2 }
 0x1b6   : > { %v621_v38 = vadd.f32 %v617_v14, %v581_v40  ;;  %v586_v39 = vmul.f32 %v2692_v4, %v2937_v48  ;;  %v596_v18 = vmul.f32 %v2695_v5, %v2937_v48  ;;  %v606_v0 = vmul.f32 %v3680_v16, %v2937_v48 }
 0x1b7   : > { %v616_v13 = vmul.f32 %v3681_v43, %v2937_v48  ;;  %v793_v20 = vadd.f32 %v2983_v29, %v591_v6  ;;  %v803_v7 = vadd.f32 %v2987_v33, %v601_v31  ;;  %v813_v1 = vadd.f32 %v2991_v22, %v611_v36  ;;  %v3688_v6 = vld [vmem:[#allocation93_spill] sm:$0xff]  ;;  %v3689_v36 = vld [vmem:[#allocation94_spill] sm:$0xff] }
 0x1b8   : > { %v823_v2 = vadd.f32 %v2995_v12, %v621_v38  ;;  %v590_v40 = vadd.f32 %v586_v39, %v550_v28  ;;  %v600_v54 = vadd.f32 %v596_v18, %v560_v59  ;;  %v610_v4 = vadd.f32 %v606_v0, %v570_v32  ;;  %v3690_v0 = vld [vmem:[#allocation95_spill] sm:$0xff] }
 0x1b9   : > { %v620_v21 = vadd.f32 %v616_v13, %v580_v3  ;;  %v833_v5 = vadd.f32 %v3043_v35, %v793_v20  ;;  %v843_v44 = vadd.f32 %v3047_v37, %v803_v7  ;;  %v853_v25 = vadd.f32 %v3051_v24, %v813_v1 }
 0x1ba   : > { %v863_v48 = vadd.f32 %v3055_v61, %v823_v2  ;;  %v792_v29 = vadd.f32 %v3009_v45, %v590_v40  ;;  %v802_v33 = vadd.f32 %v3013_v57, %v600_v54  ;;  %v812_v22 = vadd.f32 %v3017_v49, %v610_v4  ;;  %v3691_v4 = vld [vmem:[#allocation46_spill] sm:$0xff] }
 0x1bb   : > { %v822_v12 = vadd.f32 %v3021_v50, %v620_v21  ;;  %v873_v28 = vadd.f32 %v869_v41, %v833_v5  ;;  %v883_v59 = vadd.f32 %v879_v15, %v843_v44  ;;  %v893_v32 = vadd.f32 %v889_v17, %v853_v25  ;;  %v3683_v17 = vld [vmem:[#allocation74_spill] sm:$0xff]  ;;  %v3692_v5 = vld [vmem:[#allocation47_spill] sm:$0xff]  ;;  %v3693_v25 = vld [vmem:[#allocation48_spill] sm:$0xff] }
 0x1bc   : > { %v903_v3 = vadd.f32 %v899_v26, %v863_v48  ;;  %v832_v35 = vadd.f32 %v3075_v23, %v792_v29  ;;  %v842_v37 = vadd.f32 %v3079_v52, %v802_v33  ;;  %v852_v24 = vadd.f32 %v3083_v60, %v812_v22  ;;  %v3694_v29 = vld [vmem:[#allocation49_spill] sm:$0xff]  ;;  %v3695_v22 = vld [vmem:[#allocation37_spill] sm:$0xff] }
 0x1bd   : > { %v862_v61 = vadd.f32 %v3087_v51, %v822_v12  ;;  %v913_v16 = vadd.f32 %v909_v19, %v873_v28  ;;  %v923_v45 = vadd.f32 %v919_v42, %v883_v59  ;;  %v933_v56 = vadd.f32 %v929_v27, %v893_v32  ;;  %v3682_v51 = vld [vmem:[#allocation73_spill] sm:$0xff] }
 0x1be   : > { %v943_v57 = vadd.f32 %v939_v58, %v903_v3  ;;  %v872_v43 = vadd.f32 %v868_v53, %v832_v35  ;;  %v882_v49 = vadd.f32 %v878_v62, %v842_v37  ;;  %v892_v14 = vadd.f32 %v888_v63, %v852_v24  ;;  %v3684_v53 = vld [vmem:[#allocation75_spill] sm:$0xff]  ;;  %v3685_v63 = vld [vmem:[#allocation76_spill] sm:$0xff]  ;;  %v3686_v27 = vld [vmem:[#allocation89_spill] sm:$0xff] }
 0x1bf   : > { %v902_v50 = vadd.f32 %v898_v47, %v862_v61  ;;  %v908_v41 = vmul.f32 %v2704_v8, %v2943_v46  ;;  %v918_v23 = vmul.f32 %v2707_v9, %v2943_v46  ;;  %v928_v52 = vmul.f32 %v2710_v10, %v2943_v46  ;;  %v3696_v3 = vld [vmem:[#allocation77_spill] sm:$0xff]  ;;  %v3697_v35 = vld [vmem:[#allocation39_spill] sm:$0xff] }
 0x1c0   : > { %v938_v60 = vmul.f32 %v2713_v11, %v2943_v46  ;;  %v1109_v15 = vmul.f32 %v2961_v55, %v3682_v51  ;;  %v1119_v26 = vmul.f32 %v2961_v55, %v3683_v17  ;;  %v1129_v62 = vmul.f32 %v2961_v55, %v3684_v53  ;;  %v3687_v46 = vld [vmem:[#allocation92_spill] sm:$0xff]  ;;  %v3698_v24 = vld [vmem:[#allocation78_spill] sm:$0xff] }
 0x1c1   : > { %v1139_v8 = vmul.f32 %v2961_v55, %v3685_v63  ;;  %v912_v47 = vadd.f32 %v908_v41, %v872_v43  ;;  %v922_v9 = vadd.f32 %v918_v23, %v882_v49  ;;  %v932_v19 = vadd.f32 %v928_v52, %v892_v14 }
 0x1c2   : > { %v942_v42 = vadd.f32 %v938_v60, %v902_v50  ;;  %v1113_v10 = vadd.f32 %v1109_v15, %v2927_v34  ;;  %v1123_v11 = vadd.f32 %v1119_v26, %v3686_v27  ;;  %v1133_v58 = vadd.f32 %v1129_v62, %v3687_v46  ;;  %v3702_v62 = vld [vmem:[#allocation45_spill] sm:$0xff] }
 0x1c3   : > { %v1143_v31 = vadd.f32 %v1139_v8, %v3688_v6  ;;  %v1111_v38 = vmul.f32 %v3689_v36, %v3682_v51  ;;  %v1121_v39 = vmul.f32 %v3689_v36, %v3683_v17  ;;  %v1131_v55 = vmul.f32 %v3689_v36, %v3684_v53 }
 0x1c4   : > { %v1141_v18 = vmul.f32 %v3689_v36, %v3685_v63  ;;  %v1108_v34 = vmul.f32 %v3682_v51, %v3690_v0  ;;  %v1118_v13 = vmul.f32 %v3683_v17, %v3690_v0  ;;  %v1128_v20 = vmul.f32 %v3684_v53, %v3690_v0 }
 0x1c5   : > { %v1138_v7 = vmul.f32 %v3685_v63, %v3690_v0  ;;  %v1115_v1 = vadd.f32 %v1111_v38, %v913_v16  ;;  %v1125_v2 = vadd.f32 %v1121_v39, %v923_v45  ;;  %v1135_v40 = vadd.f32 %v1131_v55, %v933_v56  ;;  %v3699_v16 = vld [vmem:[#allocation79_spill] sm:$0xff]  ;;  %v3700_v56 = vld [vmem:[#allocation80_spill] sm:$0xff] }
 0x1c6   : > { %v1145_v54 = vadd.f32 %v1141_v18, %v943_v57  ;;  %v1112_v21 = vadd.f32 %v1108_v34, %v3691_v4  ;;  %v1122_v44 = vadd.f32 %v1118_v13, %v3692_v5  ;;  %v1132_v48 = vadd.f32 %v1128_v20, %v3693_v25  ;;  %v3704_v18 = vld [vmem:[#allocation81_spill] sm:$0xff]  ;;  %v3705_v0 = vld [vmem:[#allocation52_spill] sm:$0xff]  ;;  %v3706_v13 = vld [vmem:[#allocation82_spill] sm:$0xff] }
 0x1c7   : > { %v1142_v33 = vadd.f32 %v1138_v7, %v3694_v29  ;;  %v1110_v12 = vmul.f32 %v3682_v51, %v3695_v22  ;;  %v1120_v28 = vmul.f32 %v3683_v17, %v3695_v22  ;;  %v1130_v59 = vmul.f32 %v3684_v53, %v3695_v22  ;;  %v3701_v51 = vld [vmem:[#allocation43_spill] sm:$0xff]  ;;  %v3707_v7 = vld [vmem:[#allocation83_spill] sm:$0xff] }
 0x1c8   : > { %v1140_v32 = vmul.f32 %v3685_v63, %v3695_v22  ;;  %v1149_v37 = vmul.f32 %v3697_v35, %v3696_v3  ;;  %v1159_v61 = vmul.f32 %v3697_v35, %v3698_v24  ;;  %v1169_v45 = vmul.f32 %v3697_v35, %v3699_v16 }
 0x1c9   : > { %v1179_v57 = vmul.f32 %v3697_v35, %v3700_v56  ;;  %v1114_v43 = vadd.f32 %v1110_v12, %v912_v47  ;;  %v1124_v49 = vadd.f32 %v1120_v28, %v922_v9  ;;  %v1134_v14 = vadd.f32 %v1130_v59, %v932_v19 }
 0x1ca   : > { %v1144_v50 = vadd.f32 %v1140_v32, %v942_v42  ;;  %v1153_v41 = vadd.f32 %v1149_v37, %v1113_v10  ;;  %v1163_v23 = vadd.f32 %v1159_v61, %v1123_v11  ;;  %v1173_v52 = vadd.f32 %v1169_v45, %v1133_v58  ;;  %v3710_v32 = vld [vmem:[#allocation54_spill] sm:$0xff] }
 0x1cb   : > { %v1183_v60 = vadd.f32 %v1179_v57, %v1143_v31  ;;  %v1151_v15 = vmul.f32 %v3701_v51, %v3696_v3  ;;  %v1161_v17 = vmul.f32 %v3701_v51, %v3698_v24  ;;  %v1171_v26 = vmul.f32 %v3701_v51, %v3699_v16  ;;  %v3703_v31 = vld [vmem:[#allocation51_spill] sm:$0xff]  ;;  %v3711_v57 = vld [vmem:[#allocation90_spill] sm:$0xff] }
 0x1cc   : > { %v1181_v53 = vmul.f32 %v3701_v51, %v3700_v56  ;;  %v1148_v63 = vmul.f32 %v3696_v3, %v3702_v62  ;;  %v1158_v8 = vmul.f32 %v3698_v24, %v3702_v62  ;;  %v1168_v47 = vmul.f32 %v3699_v16, %v3702_v62 }
 0x1cd   : > { %v1178_v9 = vmul.f32 %v3700_v56, %v3702_v62  ;;  %v1155_v19 = vadd.f32 %v1151_v15, %v1115_v1  ;;  %v1165_v42 = vadd.f32 %v1161_v17, %v1125_v2  ;;  %v1175_v10 = vadd.f32 %v1171_v26, %v1135_v40  ;;  %v3708_v2 = vld [vmem:[#allocation84_spill] sm:$0xff]  ;;  %v3715_v15 = vld [vmem:[#allocation87_spill] sm:$0xff] }
 0x1ce   : > { %v1185_v27 = vadd.f32 %v1181_v53, %v1145_v54  ;;  %v3241_v11 = vadd.f32 %v1148_v63, %v1112_v21  ;;  %v3243_v46 = vadd.f32 %v1158_v8, %v1122_v44  ;;  %v3245_v58 = vadd.f32 %v1168_v47, %v1132_v48  ;;  %v3716_v26 = vld [vmem:[#allocation88_spill] sm:$0xff]  ;;  %v3717_v62 = vld [vmem:[#allocation36_spill] sm:$0xff] }
 0x1cf   : > { %v3247_v6 = vadd.f32 %v1178_v9, %v1142_v33  ;;  %v1150_v36 = vmul.f32 %v3696_v3, %v3703_v31  ;;  %v1160_v38 = vmul.f32 %v3698_v24, %v3703_v31  ;;  %v1170_v39 = vmul.f32 %v3699_v16, %v3703_v31  ;;  %v3709_v33 = vld [vmem:[#allocation53_spill] sm:$0xff] }
 0x1d0   : > { %v1180_v55 = vmul.f32 %v3700_v56, %v3703_v31  ;;  %v1189_v34 = vmul.f32 %v3705_v0, %v3704_v18  ;;  %v1199_v20 = vmul.f32 %v3705_v0, %v3706_v13  ;;  %v1209_v1 = vmul.f32 %v3705_v0, %v3707_v7 }
 0x1d1   : > { %v1219_v40 = vmul.f32 %v3705_v0, %v3708_v2  ;;  %v3265_v54 = vadd.f32 %v1150_v36, %v1114_v43  ;;  %v3267_v4 = vadd.f32 %v1160_v38, %v1124_v49  ;;  %v3269_v21 = vadd.f32 %v1170_v39, %v1134_v14 }
 0x1d2   : > { %v3271_v5 = vadd.f32 %v1180_v55, %v1144_v50  ;;  %v1193_v44 = vadd.f32 %v1189_v34, %v1153_v41  ;;  %v1203_v25 = vadd.f32 %v1199_v20, %v1163_v23  ;;  %v1213_v48 = vadd.f32 %v1209_v1, %v1173_v52  ;;  %v3712_v41 = vld [vmem:[#allocation85_spill] sm:$0xff]  ;;  %v3713_v23 = vld [vmem:[#allocation91_spill] sm:$0xff] }
 0x1d3   : > { %v1223_v29 = vadd.f32 %v1219_v40, %v1183_v60  ;;  %v1191_v22 = vmul.f32 %v3709_v33, %v3704_v18  ;;  %v1201_v12 = vmul.f32 %v3709_v33, %v3706_v13  ;;  %v1211_v28 = vmul.f32 %v3709_v33, %v3707_v7  ;;  %v3714_v60 = vld [vmem:[#allocation86_spill] sm:$0xff] }
 0x1d4   : > { %v1221_v59 = vmul.f32 %v3709_v33, %v3708_v2  ;;  %v1188_v3 = vmul.f32 %v3704_v18, %v3710_v32  ;;  %v1198_v35 = vmul.f32 %v3706_v13, %v3710_v32  ;;  %v1208_v37 = vmul.f32 %v3707_v7, %v3710_v32 }
 0x1d5   : > { %v1218_v24 = vmul.f32 %v3708_v2, %v3710_v32  ;;  %v1195_v61 = vadd.f32 %v1191_v22, %v1155_v19  ;;  %v1205_v16 = vadd.f32 %v1201_v12, %v1165_v42  ;;  %v1215_v45 = vadd.f32 %v1211_v28, %v1175_v10 }
 0x1d6   : > { %v1225_v56 = vadd.f32 %v1221_v59, %v1185_v27  ;;  %v1190_v43 = vmul.f32 %v3704_v18, %v3711_v57  ;;  %v1200_v49 = vmul.f32 %v3706_v13, %v3711_v57  ;;  %v1210_v14 = vmul.f32 %v3707_v7, %v3711_v57 }
 0x1d7   : > { %v1220_v50 = vmul.f32 %v3708_v2, %v3711_v57  ;;  %v1229_v52 = vmul.f32 %v3713_v23, %v3712_v41  ;;  %v1239_v51 = vmul.f32 %v3713_v23, %v3714_v60  ;;  %v1249_v17 = vmul.f32 %v3713_v23, %v3715_v15 }
 0x1d8   : > { %v1259_v53 = vmul.f32 %v3713_v23, %v3716_v26  ;;  %v1231_v63 = vmul.f32 %v3717_v62, %v3712_v41  ;;  %v1241_v8 = vmul.f32 %v3717_v62, %v3714_v60  ;;  %v1251_v47 = vmul.f32 %v3717_v62, %v3715_v15 }
 0x1d9   : > { %v1261_v9 = vmul.f32 %v3717_v62, %v3716_v26  ;;  %v1233_v19 = vadd.f32 %v1229_v52, %v1193_v44  ;;  %v1243_v42 = vadd.f32 %v1239_v51, %v1203_v25  ;;  %v1253_v10 = vadd.f32 %v1249_v17, %v1213_v48  ;;  %v3720_v48 = vld [vmem:[#allocation38_spill] sm:$0xff] }
 0x1da   : > { %v1263_v27 = vadd.f32 %v1259_v53, %v1223_v29  ;;  %v1235_v31 = vadd.f32 %v1231_v63, %v1195_v61  ;;  %v1245_v36 = vadd.f32 %v1241_v8, %v1205_v16  ;;  %v1255_v38 = vadd.f32 %v1251_v47, %v1215_v45 }
 0x1db   : > { %v1265_v39 = vadd.f32 %v1261_v9, %v1225_v56  ;;  %v1267_v55 = vmax.f32 %v1233_v19, 0.0  ;;  %v1275_v18 = vmax.f32 %v1243_v42, 0.0  ;;  %v1284_v0 = vmax.f32 %v1253_v10, 0.0 }
 0x1dc   : > { %v1293_v34 = vmax.f32 %v1263_v27, 0.0  ;;  %v1269_v13 = vmax.f32 %v1235_v31, 0.0  ;;  %v1277_v20 = vmax.f32 %v1245_v36, 0.0  ;;  %v1286_v7 = vmax.f32 %v1255_v38, 0.0 }
 0x1dd   : > { %v1295_v1 = vmax.f32 %v1265_v39, 0.0  ;;  %1271 = vst [vmem:[%s3315_s17 + $0x8] sm:$0xff] %v1267_v55  ;;  %1488 = vst [vmem:[%s3315_s17 + $0x18] sm:$0xff] %v1275_v18  ;;  %v1192_v2 = vadd.f32 %v1188_v3, %v3241_v11  ;;  %v1202_v40 = vadd.f32 %v1198_v35, %v3243_v46  ;;  %v1212_v44 = vadd.f32 %v1208_v37, %v3245_v58 }
 0x1de   : > { %1492 = vst [vmem:[%s3315_s17 + $0x28] sm:$0xff] %v1284_v0  ;;  %1496 = vst [vmem:[%s3315_s17 + $0x38] sm:$0xff] %v1293_v34  ;;  %v1222_v25 = vadd.f32 %v1218_v24, %v3247_v6  ;;  %v1228_v29 = vmul.f32 %v3712_v41, %v3720_v48  ;;  %v1238_v33 = vmul.f32 %v3714_v60, %v3720_v48 }
 0x1df   : > { %1273 = vst [vmem:[%s3315_s17 + $0x48] sm:$0xff] %v1269_v13  ;;  %1490 = vst [vmem:[%s3315_s17 + $0x58] sm:$0xff] %v1277_v20  ;;  %v1248_v11 = vmul.f32 %v3715_v15, %v3720_v48  ;;  %v1258_v46 = vmul.f32 %v3716_v26, %v3720_v48  ;;  %v1194_v58 = vadd.f32 %v1190_v43, %v3265_v54 }
 0x1e0   : > { %1494 = vst [vmem:[%s3315_s17 + $0x68] sm:$0xff] %v1286_v7  ;;  %1498 = vst [vmem:[%s3315_s17 + $0x78] sm:$0xff] %v1295_v1  ;;  %v1204_v6 = vadd.f32 %v1200_v49, %v3267_v4  ;;  %v1214_v22 = vadd.f32 %v1210_v14, %v3269_v21  ;;  %v1224_v12 = vadd.f32 %v1220_v50, %v3271_v5 }
 0x1e1   : > { %v1232_v28 = vadd.f32 %v1228_v29, %v1192_v2  ;;  %v1242_v59 = vadd.f32 %v1238_v33, %v1202_v40  ;;  %v1252_v32 = vadd.f32 %v1248_v11, %v1212_v44  ;;  %v1262_v3 = vadd.f32 %v1258_v46, %v1222_v25 }
 0x1e2   : > { %v1230_v35 = vmul.f32 %v3712_v41, %v3111_v30  ;;  %v1240_v37 = vmul.f32 %v3714_v60, %v3111_v30  ;;  %v1250_v54 = vmul.f32 %v3715_v15, %v3111_v30  ;;  %v1260_v4 = vmul.f32 %v3716_v26, %v3111_v30 }
 0x1e3   : > { %v1266_v21 = vmax.f32 %v1232_v28, 0.0  ;;  %v1274_v5 = vmax.f32 %v1242_v59, 0.0  ;;  %v1283_v24 = vmax.f32 %v1252_v32, 0.0  ;;  %v1292_v61 = vmax.f32 %v1262_v3, 0.0 }
 0x1e4   : > { %v1234_v16 = vadd.f32 %v1230_v35, %v1194_v58  ;;  %v1244_v45 = vadd.f32 %v1240_v37, %v1204_v6  ;;  %v1254_v56 = vadd.f32 %v1250_v54, %v1214_v22  ;;  %v1264_v57 = vadd.f32 %v1260_v4, %v1224_v12 }
 0x1e5   : > { %1270 = vst [vmem:[%s3315_s17] sm:$0xff] %v1266_v21  ;;  %1487 = vst [vmem:[%s3315_s17 + $0x10] sm:$0xff] %v1274_v5 }
 0x1e6   : > { %1491 = vst [vmem:[%s3315_s17 + $0x20] sm:$0xff] %v1283_v24  ;;  %1495 = vst [vmem:[%s3315_s17 + $0x30] sm:$0xff] %v1292_v61  ;;  %v1268_v30 = vmax.f32 %v1234_v16, 0.0  ;;  %v1276_v43 = vmax.f32 %v1244_v45, 0.0  ;;  %v1285_v49 = vmax.f32 %v1254_v56, 0.0  ;;  %v1294_v14 = vmax.f32 %v1264_v57, 0.0 }
 0x1e8   : > { %1272 = vst [vmem:[%s3315_s17 + $0x40] sm:$0xff] %v1268_v30  ;;  %1489 = vst [vmem:[%s3315_s17 + $0x50] sm:$0xff] %v1276_v43 }
 0x1e9   : > { %1493 = vst [vmem:[%s3315_s17 + $0x60] sm:$0xff] %v1285_v49  ;;  %1497 = vst [vmem:[%s3315_s17 + $0x70] sm:$0xff] %v1294_v14 }
 0x1ea   : > { %2067 = shalt.err (!%p2064_p4)
}
 0x1eb   : > { %s2068_s25 = scalar_lea.hbm %s3358_s21, 2048  ;;  %s2072_s11 = scalar_lea.hbm %s3723_s7, 4096 }
 0x1ec   : > { %p2069_p0 = scmp.ne.s32.totalorder %s3358_s21, %s2068_s25  ;;  %p2073_p1 = scmp.lt.u32.totalorder %s3358_s21, %s3723_s7 }
 0x1ed   : > { %p2074_p10 = scmp.lt.u32.totalorder %s2072_s11, %s2068_s25  ;;  %p2076_p9 = scmp.lt.u32.totalorder %s2068_s25, %s3358_s21 }
 0x1ee   : > { %p2070_p8 = pnand %p2069_p0, %p3724_p12 }
 0x1ef   : > { %p2075_p7 = por %p2074_p10, %p2073_p1 }
 0x1f0   : > { %p2071_p11 = pneg %p2070_p8 }
 0x1f1   : > { %p2077_p2 = por %p2076_p9, %p2075_p7 }
 0x1f3   : > { %p2078_p6 = pnand %p2077_p2, %p2071_p11 }
 0x1f5   : > { %2081 = shalt.err (!%p2078_p6)
}
 0x1f6   : > { %s2141_s9 = smov 128   ;;  %s2142_s8 = smov 8  }
 0x1f7   : > { %1899 = dma.vmem_to_hbm [thread:$0]  (%p3724_p12), %s3360_s22, 2048, %s3358_s21, %s1302_s23, %s2141_s9, %s2141_s9, %s2142_s8  }
 0x1f8 PF: > { %s3725_s0 = sld [smem:[#allocation17_spill]]  ;;  %s3726_s1 = sld [smem:[#allocation22_spill]] }
 0x1f9   : > { %s3727_s2 = sld [smem:[#allocation20_spill]] }
 0x1fe   : > { %s1331_s3 = sand.u32 1, %s3725_s0   ;;  %p3728_p13 = scmp.ne.s32.totalorder %s3726_s1, 0 }
 0x1ff   : > { %p3729_p3 = scmp.ge.s32.totalorder %s3727_s2, 2  ;;  %s1332_s12 = scalar_lea.sflag [#allocation4], %s1331_s3 }
 0x201   : > { %p1916_p5 = pnand %p3729_p3, %p3728_p13 }
 0x203   : > { %2115 = dma.done.wait (!%p1916_p5), %s1332_s12, 2048  }
 0x204   : > { %2117 = vsyncadd (!%p1916_p5), %s1332_s12, 4294965248  ;;  %s3730_s18 = sld [smem:[#allocation23_spill]]  ;;  %s3731_s15 = sld [smem:[#allocation18_spill]] }
 0x205   : > { %s3732_s16 = sld [smem:[#allocation19_spill]]  ;;  %s3733_s17 = sld [smem:[#allocation24_spill]] }
 0x20a   : > { %p20_p4 = scmp.ge.s32.totalorder %s3730_s18, 4  }
 0x20c   :  { %22 = sbr.rel (!%p20_p4) target bundleno = 14 (0xe), region = 99 }
 0x213   :  { %1337 = vsyncpa [#allocation3], 1 }
 0x214   :  { %1339 = vsyncpa [#allocation3 + $0x1], 1 }
 0x215   :  { %1340 = vsyncpa [#allocation7], 1 }
 0x216   :  { %1341 = vsyncpa [#allocation4], 1 }
 0x217   :  { %1343 = vsyncpa [#allocation4 + $0x1], 1 }
 0x218   :  { %1344 = vsyncpa [#allocation5], 1 }
 0x219   :  { %1346 = vsyncpa [#allocation5 + $0x1], 1 }
 0x21a   :  { %1347 = vsyncpa [#allocation10], 1 }

</bundles_post_ra>
